<compile_context>
chip_gen: v6e
topology: v6e:2x2x1
jax: 0.10.0
libtpu: 0.0.40
codegen_flags: <defaults>
</compile_context>

<pallas_src>
import math

import jax
import jax.numpy as jnp
from jax import lax
from jax.experimental import pallas as pl
from jax.experimental.pallas import tpu as pltpu


_VMEM_LIMIT = 32 * 1024 * 1024   # conservative scoped-VMEM budget (v5e/v6e/v7x safe)
_BN_EPS = 1e-5
_MAX_TM = 512                    # row tile cap -> multi-step, pipelined grids


# ----------------------------------------------------------------------------
# Small helpers
# ----------------------------------------------------------------------------

def _cparams(semantics=None):
    return pltpu.CompilerParams(dimension_semantics=semantics,
                                vmem_limit_bytes=_VMEM_LIMIT)


def _row_tiles(m):
    """(row tile, padded M).  Full M when small, else a <=512 divisor tile."""
    if m <= _MAX_TM:
        return m, m
    for tm in range(_MAX_TM, 7, -8):
        if m % tm == 0:
            return tm, m
    tm = 256                                   # rare ragged fallback: pad rows
    return tm, ((m + tm - 1) // tm) * tm


def _lane_fold(m, c):
    """Fold factor f (divides M) so elementwise kernels see ~128 dense lanes."""
    target = max(1, 128 // max(c, 1))
    for f in range(min(target, m), 0, -1):
        if m % f == 0:
            return f
    return 1


def _fold_matrix(channels, groups):
    """G[q', q] = 1 iff columns q', q map to the same BN channel (col % channels)."""
    return jnp.tile(jnp.eye(channels, dtype=jnp.float32), (groups, groups))


# ----------------------------------------------------------------------------
# Pallas kernels
# ----------------------------------------------------------------------------

def _make_mm_bn_relu_kernel(last_step, groups, count, npad):
    """Fused  y = A @ W + b ; BatchNorm(train) ; ReLU ; bf16 store.

    Row tiles stream through the grid (sequential); raw f32 y is stashed in a
    resident VMEM scratch while per-column sum / sum-of-squares accumulate.
    The last step folds stats of columns sharing a BN channel (for grouped
    outputs), builds scale/shift and writes the whole bf16 output block once.
    """
    inv_count = 1.0 / count

    def kernel(*refs):
        if groups > 1:
            a_ref, w_ref, b_ref, g_ref, o_ref, y_ref, s_ref, ss_ref = refs
        else:
            a_ref, w_ref, b_ref, o_ref, y_ref, s_ref, ss_ref = refs
            g_ref = None
        i = pl.program_id(0)

        @pl.when(i == 0)
        def _init():
            s_ref[...] = jnp.zeros_like(s_ref)
            ss_ref[...] = jnp.zeros_like(ss_ref)

        y = (jnp.dot(a_ref[...], w_ref[...], preferred_element_type=jnp.float32)
             + b_ref[...])
        tm = a_ref.shape[0]
        off = pl.multiple_of(i * tm, tm)
        y_ref[pl.ds(off, tm), :] = y
        s_ref[...] += jnp.sum(y, axis=0, keepdims=True)
        ss_ref[...] += jnp.sum(y * y, axis=0, keepdims=True)

        @pl.when(i == last_step)
        def _epilogue():
            s = s_ref[...]
            ss = ss_ref[...]
            if npad:                       # zero-padded A rows produced y == bias
                bb = b_ref[...]
                s = s - npad * bb
                ss = ss - npad * bb * bb
            if groups > 1:                 # fold stats of the same BN channel
                s = jnp.dot(s, g_ref[...], preferred_element_type=jnp.float32)
                ss = jnp.dot(ss, g_ref[...], preferred_element_type=jnp.float32)
            mean = s * inv_count
            var = jnp.maximum(ss * inv_count - mean * mean, 0.0)
            scale = lax.rsqrt(var + _BN_EPS)
            shift = -mean * scale
            o_ref[...] = jnp.maximum(y_ref[...] * scale + shift,
                                     0.0).astype(o_ref.dtype)

    return kernel


def _mm_bias_kernel(a_ref, w_ref, b_ref, o_ref):
    # Plain matmul + bias, bf16 store (used where BN stats are taken later).
    o_ref[...] = (jnp.dot(a_ref[...], w_ref[...],
                          preferred_element_type=jnp.float32)
                  + b_ref[...]).astype(o_ref.dtype)


def _make_bn_relu_kernel(count, fold):
    # Single-step resident kernel: stats + BN affine + ReLU in one pass.
    inv_count = 1.0 / count

    def kernel(*refs):
        if fold:
            x_ref, g_ref, o_ref = refs
        else:
            x_ref, o_ref = refs
        x = x_ref[...].astype(jnp.float32)
        s = jnp.sum(x, axis=0, keepdims=True)
        ss = jnp.sum(x * x, axis=0, keepdims=True)
        if fold:
            s = jnp.dot(s, g_ref[...], preferred_element_type=jnp.float32)
            ss = jnp.dot(ss, g_ref[...], preferred_element_type=jnp.float32)
        mean = s * inv_count
        var = jnp.maximum(ss * inv_count - mean * mean, 0.0)
        scale = lax.rsqrt(var + _BN_EPS)
        shift = -mean * scale
        o_ref[...] = jnp.maximum(x * scale + shift, 0.0).astype(o_ref.dtype)

    return kernel


# ----------------------------------------------------------------------------
# Pallas wrappers
# ----------------------------------------------------------------------------

def matmul_bn_relu(a, w, b, groups=1):
    """relu(batchnorm_train(a @ w + b)) -> bf16 (M, N), one pallas_call.

    Columns form `groups` groups sharing BN channels (channel = col % (N//groups));
    groups > 1 is used for the fused 4-phase ConvTranspose.
    """
    m, k = a.shape
    n = w.shape[1]
    tm, mp = _row_tiles(m)
    npad = mp - m
    nsteps = mp // tm
    ab = a.astype(jnp.bfloat16)
    if npad:
        ab = jnp.pad(ab, ((0, npad), (0, 0)))
    wb = w.astype(jnp.bfloat16)
    b2 = b.astype(jnp.float32).reshape(1, n)

    operands = [ab, wb, b2]
    in_specs = [pl.BlockSpec((tm, k), lambda i: (i, 0)),
                pl.BlockSpec((k, n), lambda i: (0, 0)),   # weights VMEM-resident
                pl.BlockSpec((1, n), lambda i: (0, 0))]
    if groups > 1:
        operands.append(_fold_matrix(n // groups, groups))
        in_specs.append(pl.BlockSpec((n, n), lambda i: (0, 0)))

    # TODO(synk): at full model sizes (stage output > VMEM) switch to a
    # two-pass path (row-tiled matmul+stats, then a separate affine+ReLU
    # kernel) instead of the resident-output epilogue used here.
    out = pl.pallas_call(
        _make_mm_bn_relu_kernel(nsteps - 1, groups, float(groups * m), npad),
        out_shape=jax.ShapeDtypeStruct((mp, n), jnp.bfloat16),
        grid=(nsteps,),
        in_specs=in_specs,
        out_specs=pl.BlockSpec((mp, n), lambda i: (0, 0)),   # resident output
        scratch_shapes=[pltpu.VMEM((mp, n), jnp.float32),    # raw f32 y
                        pltpu.VMEM((1, n), jnp.float32),     # sum
                        pltpu.VMEM((1, n), jnp.float32)],    # sum of squares
        compiler_params=_cparams(("arbitrary",)),            # stats accumulate
    )(*operands)
    return out if npad == 0 else out[:m]


def matmul_bias(a, w, b):
    """y = a @ w + b -> bf16 (M, N); no BN (stats taken after inv transforms)."""
    m, k = a.shape
    n = w.shape[1]
    tm, mp = _row_tiles(m)
    ab = a.astype(jnp.bfloat16)
    if mp != m:
        ab = jnp.pad(ab, ((0, mp - m), (0, 0)))
    out = pl.pallas_call(
        _mm_bias_kernel,
        out_shape=jax.ShapeDtypeStruct((mp, n), jnp.bfloat16),
        grid=(mp // tm,),
        in_specs=[pl.BlockSpec((tm, k), lambda i: (i, 0)),
                  pl.BlockSpec((k, n), lambda i: (0, 0)),
                  pl.BlockSpec((1, n), lambda i: (0, 0))],
        out_specs=pl.BlockSpec((tm, n), lambda i: (i, 0)),
        compiler_params=_cparams(("parallel",)),             # megacore-able
    )(ab, w.astype(jnp.bfloat16), b.astype(jnp.float32).reshape(1, n))
    return out if mp == m else out[:m]


def bn_relu(x2):
    """relu(batchnorm_train(x)) over (M, C) in one resident pallas_call.

    Rows are folded into the lane axis, (M, C) -> (M/f, f*C) with f*C ~ 128,
    so narrow-channel stages still get lane-dense loads/stores; a fold matrix
    maps densified per-column stats back onto their BN channel (col % C)."""
    m, c = x2.shape
    f = _lane_fold(m, c)
    md, cd = m // f, f * c
    xd = x2.astype(jnp.bfloat16).reshape(md, cd)
    operands = [xd]
    if f > 1:
        operands.append(_fold_matrix(c, f))
    out = pl.pallas_call(
        _make_bn_relu_kernel(float(m), f > 1),
        out_shape=jax.ShapeDtypeStruct((md, cd), jnp.bfloat16),
        compiler_params=_cparams(),
    )(*operands)
    return out.reshape(m, c)


# ----------------------------------------------------------------------------
# Conv building blocks (NHWC)
# ----------------------------------------------------------------------------

def _im2col_dil(x, kh, kw, dil):
    """'same', stride-1 dilated conv patches.  x NHWC -> (N*H*W, kh*kw*C) bf16.

    TODO(synk): replace the XLA concat of kh*kw shifted copies with in-kernel
    tap accumulation (single read of the padded input) for large activations.
    """
    n, h, w, c = x.shape
    ph = dil * (kh - 1) // 2
    pw = dil * (kw - 1) // 2
    xb = x.astype(jnp.bfloat16)
    xp = jnp.pad(xb, ((0, 0), (ph, ph), (pw, pw), (0, 0)))
    pats = [xp[:, i * dil:i * dil + h, j * dil:j * dil + w, :]
            for i in range(kh) for j in range(kw)]
    return jnp.concatenate(pats, axis=-1).reshape(n * h * w, kh * kw * c)


def _wmat(w):
    """(O, Cin, kh, kw) -> (kh*kw*Cin, O) matching _im2col_dil column order."""
    return jnp.transpose(w, (2, 3, 1, 0)).reshape(-1, w.shape[0])


def _block_diag(w1, w2):
    k1, n1 = w1.shape
    k2, n2 = w2.shape
    top = jnp.concatenate([w1, jnp.zeros((k1, n2), w1.dtype)], axis=1)
    bot = jnp.concatenate([jnp.zeros((k2, n1), w2.dtype), w2], axis=1)
    return jnp.concatenate([top, bot], axis=0)


def conv1x1_bn_relu(x, w, b):
    """1x1 conv + BatchNorm(train) + ReLU.  x NHWC; w (O, Cin, 1, 1); b (O,)."""
    n, h, ww, c = x.shape
    o = w.shape[0]
    y = matmul_bn_relu(x.reshape(-1, c), jnp.transpose(w[:, :, 0, 0]), b)
    return y.reshape(n, h, ww, o)


def conv_transpose_s2_bn_relu(x, wt, b):
    """ConvTranspose2d(k=3, stride=2, padding=1, output_padding=1) + BN + ReLU.

    All four sub-pixel phases are fused into ONE wide lane-dense matmul with
    zero-padded taps; BN stats are folded across the 4 phase groups in-kernel.
    x NHWC, wt (Cin, Cout, 3, 3), b (Cout,)."""
    n, h, w, c = x.shape
    co = wt.shape[1]
    m = n * h * w
    xb = x.astype(jnp.bfloat16)
    # shifted inputs (zero at the out-of-range border)
    x01 = jnp.pad(xb, ((0, 0), (0, 0), (0, 1), (0, 0)))[:, :, 1:, :]   # in[i, j+1]
    x10 = jnp.pad(xb, ((0, 0), (0, 1), (0, 0), (0, 0)))[:, 1:, :, :]   # in[i+1, j]
    x11 = jnp.pad(xb, ((0, 0), (0, 1), (0, 1), (0, 0)))[:, 1:, 1:, :]  # in[i+1, j+1]
    a = jnp.concatenate([xb, x01, x10, x11], axis=-1).reshape(m, 4 * c)

    z = jnp.zeros((c, co), jnp.float32)
    tap = lambda ky, kx: wt[:, :, ky, kx]        # (Cin, Cout)
    # out[2i+a, 2j+b]: contributing taps per phase (row blocks: x, x01, x10, x11)
    wcols = [
        jnp.concatenate([tap(1, 1), z,          z,          z         ], 0),  # ee
        jnp.concatenate([tap(1, 2), tap(1, 0),  z,          z         ], 0),  # eo
        jnp.concatenate([tap(2, 1), z,          tap(0, 1),  z         ], 0),  # oe
        jnp.concatenate([tap(2, 2), tap(2, 0),  tap(0, 2),  tap(0, 0) ], 0),  # oo
    ]
    wwide = jnp.concatenate(wcols, axis=1)       # (4*Cin, 4*Cout)
    bwide = jnp.tile(b, 4)

    y = matmul_bn_relu(a, wwide, bwide, groups=4)      # (m, 4*co) bf16
    # Interleave the four phases into (n, 2h, 2w, co).
    y = y.reshape(n, h, w, 2, 2, co)
    y = jnp.transpose(y, (0, 1, 3, 2, 4, 5)).reshape(n, 2 * h, 2 * w, co)
    return y


# --- h / v transforms (faithful port of the PyTorch reshuffling, NHWC) -------

def h_transform(x):
    n, h, w, c = x.shape
    x = jnp.pad(x, ((0, 0), (0, 0), (0, w), (0, 0)))
    x = x.reshape(n, 2 * h * w, c)[:, :-w, :]
    return x.reshape(n, h, 2 * w - 1, c)


def inv_h_transform(x):
    n, h, l, c = x.shape
    x = x.reshape(n, h * l, c)
    x = jnp.pad(x, ((0, 0), (0, h), (0, 0)))
    x = x.reshape(n, h, 2 * h, c)[:, :, :h, :]
    return x


def v_transform(x):
    x = jnp.transpose(x, (0, 2, 1, 3))
    n, h, w, c = x.shape
    x = jnp.pad(x, ((0, 0), (0, 0), (0, w), (0, 0)))
    x = x.reshape(n, 2 * h * w, c)[:, :-w, :]
    x = x.reshape(n, h, 2 * w - 1, c)
    return jnp.transpose(x, (0, 2, 1, 3))


def inv_v_transform(x):
    x = jnp.transpose(x, (0, 2, 1, 3))
    n, h, l, c = x.shape
    x = x.reshape(n, h * l, c)
    x = jnp.pad(x, ((0, 0), (0, h), (0, 0)))
    x = x.reshape(n, h, 2 * h, c)[:, :, :h, :]
    return jnp.transpose(x, (0, 2, 1, 3))


# ----------------------------------------------------------------------------
# Parameter init (deterministic, Kaiming-style) and module forwards
# ----------------------------------------------------------------------------

def init_conv(key, cout, cin, kh, kw, bias=True):
    wk, bk = jax.random.split(key)
    fan_in = cin * kh * kw
    w = jax.random.normal(wk, (cout, cin, kh, kw), jnp.float32) * math.sqrt(2.0 / fan_in)
    if bias:
        bound = 1.0 / math.sqrt(fan_in)
        b = jax.random.uniform(bk, (cout,), jnp.float32, -bound, bound)
    else:
        b = jnp.zeros((cout,), jnp.float32)
    return w, b


def init_conv_t(key, cin, cout, k):
    wk, bk = jax.random.split(key)
    fan = cout * k * k
    w = jax.random.normal(wk, (cin, cout, k, k), jnp.float32) * math.sqrt(2.0 / fan)
    bound = 1.0 / math.sqrt(cin * k * k)
    b = jax.random.uniform(bk, (cout,), jnp.float32, -bound, bound)
    return w, b


def init_asterisk(key, in_ch, n_filters, cov_size):
    k = 3 if cov_size == 5 else 5
    c4, c8 = in_ch // 4, in_ch // 8
    cc = c4 + c4
    ks = jax.random.split(key, 7)
    return {
        "conv1": init_conv(ks[0], c4, in_ch, 1, 1),
        "deconv1": init_conv(ks[1], c8, c4, 1, k),
        "deconv2": init_conv(ks[2], c8, c4, k, 1),
        "deconv3": init_conv(ks[3], c8, c4, k, 1),
        "deconv4": init_conv(ks[4], c8, c4, 1, k),
        "conv3_t": init_conv_t(ks[5], cc, cc, 3),
        "conv4": init_conv(ks[6], n_filters, cc, 1, 1),
    }


def asterisk_tail(p, x, dil):
    """Everything after conv1+bn1+relu1 of one Asterisk branch. x: NHWC (c4 ch)."""
    n, h, w, _ = x.shape
    m = n * h * w
    w1, b1 = p["deconv1"]
    w2, b2 = p["deconv2"]
    w3, b3 = p["deconv3"]
    w4, b4 = p["deconv4"]
    kk = w1.shape[3]
    c8 = w1.shape[0]

    # deconv1 (1,k) + deconv2 (k,1): one block-diagonal matmul, fused bn2/relu2
    # (their BN channels are independent, so the fused per-column BN is exact).
    a12 = jnp.concatenate([_im2col_dil(x, 1, kk, dil),
                           _im2col_dil(x, kk, 1, dil)], axis=-1)
    y12 = matmul_bn_relu(a12, _block_diag(_wmat(w1), _wmat(w2)),
                         jnp.concatenate([b1, b2]))
    y12 = y12.reshape(n, h, w, 2 * c8)

    # deconv3 / deconv4: raw convs (BN stats must be taken AFTER the inverse
    # h/v transforms), merged into one block-diagonal matmul.
    # NOTE: like the original usage, this assumes square spatial dims (h == w).
    xh = h_transform(x)                          # (n, h, 2w-1, c4)
    xv = v_transform(x)                          # (n, 2h-1, w, c4)
    a34 = jnp.concatenate([_im2col_dil(xh, kk, 1, dil),
                           _im2col_dil(xv, 1, kk, dil)], axis=-1)
    y34 = matmul_bias(a34, _block_diag(_wmat(w3), _wmat(w4)),
                      jnp.concatenate([b3, b4]))
    y3 = inv_h_transform(y34[:, :c8].reshape(n, h, 2 * w - 1, c8))
    y4 = inv_v_transform(y34[:, c8:].reshape(n, 2 * h - 1, w, c8))
    y34r = bn_relu(jnp.concatenate([y3, y4], axis=-1).reshape(m, 2 * c8))

    xcat = jnp.concatenate([y12, y34r.reshape(n, h, w, 2 * c8)], axis=-1)
    xcat = conv_transpose_s2_bn_relu(xcat, *p["conv3_t"])
    return conv1x1_bn_relu(xcat, *p["conv4"])


def init_decoder_block(key, in_ch, filt):
    ks = jax.random.split(key, 4)
    return {
        "a1": init_asterisk(ks[0], in_ch, filt // 2, 5),
        "a2": init_asterisk(ks[1], in_ch, filt // 2, 9),
        "a3": init_asterisk(ks[2], in_ch, filt // 2, 13),
        "conv1": init_conv(ks[3], filt, filt // 2 * 3, 1, 1, bias=False),
    }


def decoder_block_fwd(p, x):
    # The three per-Asterisk 1x1 `conv1` projections share the same input and
    # Cin: fuse them into one wide matmul + fused BN/ReLU and split afterwards.
    w1 = jnp.concatenate([p["a1"]["conv1"][0], p["a2"]["conv1"][0],
                          p["a3"]["conv1"][0]], axis=0)
    b1 = jnp.concatenate([p["a1"]["conv1"][1], p["a2"]["conv1"][1],
                          p["a3"]["conv1"][1]], axis=0)
    y = conv1x1_bn_relu(x, w1, b1)
    c4 = p["a1"]["conv1"][0].shape[0]
    x1 = asterisk_tail(p["a1"], y[..., 0 * c4:1 * c4], dil=2)   # cov_size 5
    x2 = asterisk_tail(p["a2"], y[..., 1 * c4:2 * c4], dil=2)   # cov_size 9
    x3 = asterisk_tail(p["a3"], y[..., 2 * c4:3 * c4], dil=3)   # cov_size 13
    xcat = jnp.concatenate([x1, x2, x3], axis=-1)
    return conv1x1_bn_relu(xcat, *p["conv1"])


def init_decoder2(key, filters=(32, 64, 128, 256)):
    ks = jax.random.split(key, 7)
    f0 = filters[0]
    return {
        "decoder4": init_decoder_block(ks[0], filters[3], f0),
        "decoder3": init_decoder_block(ks[1], f0, f0 // 2),
        "decoder2": init_decoder_block(ks[2], f0 // 2, f0 // 4),
        "decoder1": init_decoder_block(ks[3], f0 // 4, f0 // 4),
        "conv_e3": init_conv(ks[4], f0, filters[2], 1, 1, bias=False),
        "conv_e2": init_conv(ks[5], f0 // 2, filters[1], 1, 1, bias=False),
        "conv_e1": init_conv(ks[6], f0 // 4, filters[0], 1, 1, bias=False),
    }


def decoder2_fwd(p, e1, e2, e3, e4):
    """Inputs / output are NCHW (PyTorch convention); internals are NHWC bf16."""
    to_nhwc = lambda t: jnp.transpose(t, (0, 2, 3, 1)).astype(jnp.float32)
    e1, e2, e3, e4 = map(to_nhwc, (e1, e2, e3, e4))

    d4 = decoder_block_fwd(p["decoder4"], e4) + conv1x1_bn_relu(e3, *p["conv_e3"])
    d3 = decoder_block_fwd(p["decoder3"], d4) + conv1x1_bn_relu(e2, *p["conv_e2"])
    d2 = decoder_block_fwd(p["decoder2"], d3) + conv1x1_bn_relu(e1, *p["conv_e1"])
    d1 = decoder_block_fwd(p["decoder1"], d2)
    return jnp.transpose(d1, (0, 3, 1, 2)).astype(jnp.float32)   # back to NCHW


# ----------------------------------------------------------------------------
# Main
# ----------------------------------------------------------------------------

if __name__ == "__main__":
    key = jax.random.PRNGKey(0)
    pkey, k1, k2, k3, k4, kchk = jax.random.split(key, 6)

    # --- kernel-level sanity check of the fused matmul+BN+ReLU vs XLA --------
    def _bn_relu_ref(y, groups=1):
        m, nn = y.shape
        co = nn // groups
        yg = y.reshape(m, groups, co)
        mean = yg.mean(axis=(0, 1), keepdims=True)
        var = yg.var(axis=(0, 1), keepdims=True)          # biased, like BN train
        out = (yg - mean) * lax.rsqrt(var + _BN_EPS)
        return jnp.maximum(out, 0.0).reshape(m, nn)

    a = jax.random.normal(kchk, (1003, 40), jnp.float32)   # exercises row padding
    wchk = jax.random.normal(k1, (40, 24), jnp.float32)
    bchk = jax.random.normal(k2, (24,), jnp.float32)
    yref = (a.astype(jnp.bfloat16).astype(jnp.float32)
            @ wchk.astype(jnp.bfloat16).astype(jnp.float32) + bchk)
    got = matmul_bn_relu(a, wchk, bchk).astype(jnp.float32)
    assert bool(jnp.allclose(got, _bn_relu_ref(yref), rtol=6e-2, atol=6e-2))

    yref_g = (a[:64].astype(jnp.bfloat16).astype(jnp.float32)
              @ wchk.astype(jnp.bfloat16).astype(jnp.float32) + bchk)
    got_g = matmul_bn_relu(a[:64], wchk, bchk, groups=2).astype(jnp.float32)
    assert bool(jnp.allclose(got_g, _bn_relu_ref(yref_g, groups=2),
                             rtol=6e-2, atol=6e-2))

    # Small-but-consistent shapes (PyTorch default filters scaled down 8x).
    filters = (32, 64, 128, 256)
    params = init_decoder2(pkey, filters)

    B, S = 2, 4
    e4 = jax.random.normal(k4, (B, filters[3], S, S), jnp.float32)          # (2,256,4,4)
    e3 = jax.random.normal(k3, (B, filters[2], 2 * S, 2 * S), jnp.float32)  # (2,128,8,8)
    e2 = jax.random.normal(k2, (B, filters[1], 4 * S, 4 * S), jnp.float32)  # (2,64,16,16)
    e1 = jax.random.normal(k1, (B, filters[0], 8 * S, 8 * S), jnp.float32)  # (2,32,32,32)

    fwd = jax.jit(decoder2_fwd)
    out = jax.block_until_ready(fwd(params, e1, e2, e3, e4))

    assert out.shape == (B, filters[0] // 4, 16 * S, 16 * S), out.shape
    assert bool(jnp.all(jnp.isfinite(out)))
    print("KERNEL_OK")
</pallas_src>

<mosaic_0001>
module attributes {stable_mosaic.version = 11 : i64} {
  func.func @kernel(%arg0: i32, %arg1: memref<256x40xbf16, #tpu.memory_space<vmem>>, %arg2: memref<40x24xbf16, #tpu.memory_space<vmem>>, %arg3: memref<1x24xf32, #tpu.memory_space<vmem>>, %arg4: memref<1024x24xbf16, #tpu.memory_space<vmem>>, %arg5: memref<1024x24xf32, #tpu.memory_space<vmem>>, %arg6: memref<1x24xf32, #tpu.memory_space<vmem>>, %arg7: memref<1x24xf32, #tpu.memory_space<vmem>>) attributes {dimension_semantics = [#tpu.dimension_semantics<arbitrary>], iteration_bounds = array<i64: 4>, scalar_prefetch = 0 : i64, scratch_operands = 3 : i64, tpu.core_type = #tpu.core_type<tc>, window_params = [{transform_indices = @transform_0, window_bounds = array<i64: 256, 40>}, {pipeline_mode = #tpu.pipeline_mode<synchronous>, transform_indices = @transform_1, window_bounds = array<i64: 40, 24>}, {pipeline_mode = #tpu.pipeline_mode<synchronous>, transform_indices = @transform_2, window_bounds = array<i64: 1, 24>}, {pipeline_mode = #tpu.pipeline_mode<synchronous>, transform_indices = @transform_3, window_bounds = array<i64: 1024, 24>}]} {
    %c0_i32 = arith.constant 0 : i32
    %0 = arith.cmpi eq, %arg0, %c0_i32 : i32
    %1 = arith.extui %0 : i1 to i32
    %c0_i32_0 = arith.constant 0 : i32
    %2 = arith.cmpi ne, %1, %c0_i32_0 : i32
    scf.if %2 {
      %cst_18 = arith.constant 0.000000e+00 : f32
      %27 = vector.broadcast %cst_18 : f32 to vector<1x24xf32>
      %c0_19 = arith.constant 0 : index
      %c0_20 = arith.constant 0 : index
      %28 = vector.load %arg6[%c0_19, %c0_20] : memref<1x24xf32, #tpu.memory_space<vmem>>, vector<1x24xf32>
      tpu.vector_store %arg6[%c0_19, %c0_20], %27 {strides = array<i32>} : memref<1x24xf32, #tpu.memory_space<vmem>>, vector<1x24xf32>,
      %cst_21 = arith.constant 0.000000e+00 : f32
      %29 = vector.broadcast %cst_21 : f32 to vector<1x24xf32>
      %c0_22 = arith.constant 0 : index
      %c0_23 = arith.constant 0 : index
      %30 = vector.load %arg7[%c0_22, %c0_23] : memref<1x24xf32, #tpu.memory_space<vmem>>, vector<1x24xf32>
      tpu.vector_store %arg7[%c0_22, %c0_23], %29 {strides = array<i32>} : memref<1x24xf32, #tpu.memory_space<vmem>>, vector<1x24xf32>,
    } else {
    }
    %c0 = arith.constant 0 : index
    %c0_1 = arith.constant 0 : index
    %3 = vector.load %arg1[%c0, %c0_1] : memref<256x40xbf16, #tpu.memory_space<vmem>>, vector<256x40xbf16>
    %c0_2 = arith.constant 0 : index
    %c0_3 = arith.constant 0 : index
    %4 = vector.load %arg2[%c0_2, %c0_3] : memref<40x24xbf16, #tpu.memory_space<vmem>>, vector<40x24xbf16>
    %cst = arith.constant dense<0.000000e+00> : vector<256x24xf32>
    %5 = tpu.matmul %3, %4, %cst {dimension_numbers = #tpu.dot_dimension_numbers<[1], [0], [0], [1], [0, 0, 1, 1], [], []>} : vector<256x40xbf16>, vector<40x24xbf16>, vector<256x24xf32> -> vector<256x24xf32>
    %c0_4 = arith.constant 0 : index
    %c0_5 = arith.constant 0 : index
    %6 = vector.load %arg3[%c0_4, %c0_5] : memref<1x24xf32, #tpu.memory_space<vmem>>, vector<1x24xf32>
    %7 = vector.broadcast %6 : vector<1x24xf32> to vector<256x24xf32>
    %8 = arith.addf %5, %7 : vector<256x24xf32>
    %c256_i32 = arith.constant 256 : i32
    %9 = arith.muli %arg0, %c256_i32 : i32
    %10 = tpu.assume_multiple %9, 256 : i32
    %11 = arith.index_cast %10 : i32 to index
    %c0_6 = arith.constant 0 : index
    %12 = vector.load %arg5[%11, %c0_6] : memref<1024x24xf32, #tpu.memory_space<vmem>>, vector<256x24xf32>
    tpu.vector_store %arg5[%11, %c0_6], %8 {strides = array<i32>} : memref<1024x24xf32, #tpu.memory_space<vmem>>, vector<256x24xf32>,
    %c0_7 = arith.constant 0 : index
    %c0_8 = arith.constant 0 : index
    %13 = vector.load %arg6[%c0_7, %c0_8] : memref<1x24xf32, #tpu.memory_space<vmem>>, vector<1x24xf32>
    %cst_9 = arith.constant dense<0.000000e+00> : vector<24xf32>
    %14 = vector.multi_reduction <add>, %8, %cst_9 [0] : vector<256x24xf32> to vector<24xf32>
    %15 = vector.shape_cast %14 : vector<24xf32> to vector<1x24xf32>
    %16 = arith.addf %13, %15 : vector<1x24xf32>
    %c0_10 = arith.constant 0 : index
    %c0_11 = arith.constant 0 : index
    %17 = vector.load %arg6[%c0_10, %c0_11] : memref<1x24xf32, #tpu.memory_space<vmem>>, vector<1x24xf32>
    tpu.vector_store %arg6[%c0_10, %c0_11], %16 {strides = array<i32>} : memref<1x24xf32, #tpu.memory_space<vmem>>, vector<1x24xf32>,
    %c0_12 = arith.constant 0 : index
    %c0_13 = arith.constant 0 : index
    %18 = vector.load %arg7[%c0_12, %c0_13] : memref<1x24xf32, #tpu.memory_space<vmem>>, vector<1x24xf32>
    %19 = arith.mulf %8, %8 : vector<256x24xf32>
    %cst_14 = arith.constant dense<0.000000e+00> : vector<24xf32>
    %20 = vector.multi_reduction <add>, %19, %cst_14 [0] : vector<256x24xf32> to vector<24xf32>
    %21 = vector.shape_cast %20 : vector<24xf32> to vector<1x24xf32>
    %22 = arith.addf %18, %21 : vector<1x24xf32>
    %c0_15 = arith.constant 0 : index
    %c0_16 = arith.constant 0 : index
    %23 = vector.load %arg7[%c0_15, %c0_16] : memref<1x24xf32, #tpu.memory_space<vmem>>, vector<1x24xf32>
    tpu.vector_store %arg7[%c0_15, %c0_16], %22 {strides = array<i32>} : memref<1x24xf32, #tpu.memory_space<vmem>>, vector<1x24xf32>,
    %c3_i32 = arith.constant 3 : i32
    %24 = arith.cmpi eq, %arg0, %c3_i32 : i32
    %25 = arith.extui %24 : i1 to i32
    %c0_i32_17 = arith.constant 0 : i32
    %26 = arith.cmpi ne, %25, %c0_i32_17 : i32
    scf.if %26 {
      %c0_18 = arith.constant 0 : index
      %c0_19 = arith.constant 0 : index
      %27 = vector.load %arg6[%c0_18, %c0_19] : memref<1x24xf32, #tpu.memory_space<vmem>>, vector<1x24xf32>
      %c0_20 = arith.constant 0 : index
      %c0_21 = arith.constant 0 : index
      %28 = vector.load %arg7[%c0_20, %c0_21] : memref<1x24xf32, #tpu.memory_space<vmem>>, vector<1x24xf32>
      %c0_22 = arith.constant 0 : index
      %c0_23 = arith.constant 0 : index
      %29 = vector.load %arg3[%c0_22, %c0_23] : memref<1x24xf32, #tpu.memory_space<vmem>>, vector<1x24xf32>
      %cst_24 = arith.constant 2.100000e+01 : f32
      %30 = vector.broadcast %cst_24 : f32 to vector<1x24xf32>
      %31 = arith.mulf %30, %29 : vector<1x24xf32>
      %32 = arith.subf %27, %31 : vector<1x24xf32>
      %cst_25 = arith.constant 2.100000e+01 : f32
      %33 = vector.broadcast %cst_25 : f32 to vector<1x24xf32>
      %34 = arith.mulf %33, %29 : vector<1x24xf32>
      %35 = arith.mulf %34, %29 : vector<1x24xf32>
      %36 = arith.subf %28, %35 : vector<1x24xf32>
      %cst_26 = arith.constant 9.97008988E-4 : f32
      %37 = vector.broadcast %cst_26 : f32 to vector<1x24xf32>
      %38 = arith.mulf %32, %37 : vector<1x24xf32>
      %cst_27 = arith.constant 9.97008988E-4 : f32
      %39 = vector.broadcast %cst_27 : f32 to vector<1x24xf32>
      %40 = arith.mulf %36, %39 : vector<1x24xf32>
      %41 = arith.mulf %38, %38 : vector<1x24xf32>
      %42 = arith.subf %40, %41 : vector<1x24xf32>
      %cst_28 = arith.constant 0.000000e+00 : f32
      %43 = vector.broadcast %cst_28 : f32 to vector<1x24xf32>
      %44 = arith.maximumf %42, %43 : vector<1x24xf32>
      %cst_29 = arith.constant 9.99999974E-6 : f32
      %45 = vector.broadcast %cst_29 : f32 to vector<1x24xf32>
      %46 = arith.addf %44, %45 : vector<1x24xf32>
      %47 = math.rsqrt %46 : vector<1x24xf32>
      %cst_30 = arith.constant 0.000000e+00 : f32
      %48 = vector.broadcast %cst_30 : f32 to vector<1x24xf32>
      %49 = arith.subf %48, %38 : vector<1x24xf32>
      %50 = arith.mulf %49, %47 : vector<1x24xf32>
      %c0_31 = arith.constant 0 : index
      %c0_32 = arith.constant 0 : index
      %51 = vector.load %arg5[%c0_31, %c0_32] : memref<1024x24xf32, #tpu.memory_space<vmem>>, vector<1024x24xf32>
      %52 = vector.broadcast %47 : vector<1x24xf32> to vector<1024x24xf32>
      %53 = arith.mulf %51, %52 : vector<1024x24xf32>
      %54 = vector.broadcast %50 : vector<1x24xf32> to vector<1024x24xf32>
      %55 = arith.addf %53, %54 : vector<1024x24xf32>
      %cst_33 = arith.constant 0.000000e+00 : f32
      %56 = vector.broadcast %cst_33 : f32 to vector<1024x24xf32>
      %57 = arith.maximumf %55, %56 : vector<1024x24xf32>
      %58 = arith.truncf %57 : vector<1024x24xf32> to vector<1024x24xbf16>
      %c0_34 = arith.constant 0 : index
      %c0_35 = arith.constant 0 : index
      %59 = vector.load %arg4[%c0_34, %c0_35] : memref<1024x24xbf16, #tpu.memory_space<vmem>>, vector<1024x24xbf16>
      tpu.vector_store %arg4[%c0_34, %c0_35], %58 {strides = array<i32>} : memref<1024x24xbf16, #tpu.memory_space<vmem>>, vector<1024x24xbf16>,
    } else {
    }
    return
  }
  func.func @transform_0(%arg0: i32) -> (i32, i32) {
    %c0_i32 = arith.constant 0 : i32
    %c0_i32_0 = arith.constant 0 : i32
    return %arg0, %c0_i32 : i32, i32
  }
  func.func @transform_1(%arg0: i32) -> (i32, i32) {
    %c0_i32 = arith.constant 0 : i32
    %c0_i32_0 = arith.constant 0 : i32
    %c0_i32_1 = arith.constant 0 : i32
    return %c0_i32, %c0_i32_0 : i32, i32
  }
  func.func @transform_2(%arg0: i32) -> (i32, i32) {
    %c0_i32 = arith.constant 0 : i32
    %c0_i32_0 = arith.constant 0 : i32
    %c0_i32_1 = arith.constant 0 : i32
    return %c0_i32, %c0_i32_0 : i32, i32
  }
  func.func @transform_3(%arg0: i32) -> (i32, i32) {
    %c0_i32 = arith.constant 0 : i32
    %c0_i32_0 = arith.constant 0 : i32
    %c0_i32_1 = arith.constant 0 : i32
    return %c0_i32, %c0_i32_0 : i32, i32
  }
}

</mosaic_0001>

<bundles_post_ra>
// kernel: tpu_custom_call.1
= control target key start
LH: loop header
LB: loop body
LE: loop exit
PB: predicated region body
PF: predicated region fallthrough
CT: control target
= control target key end

     0   :  { %s2373_s12 = smov 0   ;;  %s3477_s0 = inlined_call_operand.vmem [shape: bf16[1024,40], index: 0, kind: input, shape index: {}]   ;;  %s3478_s1 = inlined_call_operand.vmem [shape: bf16[40,24], index: 1, kind: input, shape index: {}]   ;;  %s3479_s2 = inlined_call_operand.vmem [shape: f32[1,24], index: 2, kind: input, shape index: {}]   ;;  %s3480_s3 = inlined_call_operand.vmem [shape: bf16[1024,24], index: 3, kind: output, shape index: {}]  }
   0x1 LB: > { %s2379_s13 = sadd.s32 4294967295, %s2350_s12   ;;  %p1949_p0 = scmp.ge.s32.totalorder %s2350_s12, 1  ;;  %s2350_s12 = sphi %s2373_s12, %s13_s12  }
   0x2   : > { %p133_p1 = scmp.lt.s32.totalorder %s2350_s12, 5 }
   0x4   : > { %p134_p2 = pnand %p1949_p0, %p133_p1 }
   0x5   : > { %s1950_s14 = sshll.u32 (!%p134_p2), %s2379_s13, 5  ;;  %p1952_p4 = scmp.ne.s32.totalorder (!%p134_p2), %s2379_s13, 0 }
   0x6   : > { %137 = sbr.rel (%p134_p2) target bundleno = 492 (0x1ec), region = 32  ;;  %p153_p3 = scmp.lt.s32.totalorder (!%p134_p2), %s1950_s14, 127 }
   0xb   : > { %s3482_s14 = smov (!%p153_p3, %s1950_s14), 127  ;;  %162 = sbr.rel (%p1952_p4) target bundleno = 18 (0x12), region = 36 }
   0xc   : > { %s1951_s15 = sshll.u32 %s3482_s14, 2 }
   0xd   : > { %s2387_s18 = scalar_lea.vmem %s3477_s0, %s1951_s15 }
  0x10   : > { %vm163_vm0 = vcmask 188416   ;;  %v2352_v0 = vmov 0.0  }
  0x11   : > { %164 = vst.msk [vmem:[#allocation3] sm:$0x1] %vm163_vm0, %v2352_v0  ;;  %165 = vst.msk [vmem:[#allocation4] sm:$0x1] %vm163_vm0, %v2352_v0 }
  0x12 PF: > { %v2323_v1 = vld [vmem:[%s3478_s1 + $0x10] ss:$0 sps:$4 sm:$0xff]   ;;  %vm354_vm1 = vcmask 1043456   ;;  %v2324_v2 = vld [vmem:[%s3478_s1 + $0x8] sm:$0xff]   ;;  %v2326_v4 = vld [vmem:[%s2387_s18] sm:$0xff]   ;;  %vm305_vm2 = vcmask 326656  }
  0x13   : > { %2312 = vmatprep.subr.msk.bf16.mxu0 %vm354_vm1, %v2323_v1  ;;  %v356_v3 = vsel %vm354_vm1, %v2323_v1, 0  ;;  %2313 = vmatprep.subr.msk.bf16.mxu1 %vm354_vm1, %v2323_v1  ;;  %v2325_v5 = vld [vmem:[%s3478_s1] sm:$0xff]   ;;  %v2327_v6 = vld [vmem:[%s2387_s18 + $0x8] sm:$0xff]   ;;  %v2328_v7 = vld [vmem:[%s2387_s18 + $0x10] sm:$0xff]   ;;  %s1989_s25 = sshll.u32 %s2379_s13, 8  ;;  %vm521_vm3 = vcmask 195584  }
  0x14   : > { %2269 = vmatpush3.bf16.msra.mxu0 %v356_v3  ;;  %2309 = vmatpush3.bf16.msra.mxu1 %v356_v3  ;;  %v2334_v8 = vld [vmem:[%s2387_s18 + $0x40] sm:$0xff]   ;;  %v2335_v9 = vld [vmem:[%s2387_s18 + $0x48] sm:$0xff]   ;;  %v2336_v10 = vld [vmem:[%s2387_s18 + $0x50] sm:$0xff]   ;;  %s2441_s28 = scalar_lea.vmem [#allocation2], %s1989_s25  ;;  %vm625_vm4 = vcmask 188416   ;;  %p1990_p5 = scmp.ne.s32.totalorder %s2379_s13, 3 }
  0x15   : > { %2270 = vmatprep.subr.bf16.mxu0 %v2324_v2  ;;  %2307 = vmatprep.subr.bf16.mxu1 %v2324_v2  ;;  %v2329_v11 = vld [vmem:[%s2387_s18 + $0x18] sm:$0xff]   ;;  %v2330_v13 = vld [vmem:[%s2387_s18 + $0x20] sm:$0xff]   ;;  %v2331_v15 = vld [vmem:[%s2387_s18 + $0x28] sm:$0xff]  }
  0x16   : > { %2274 = vmatprep.mubr.msk.bf16.mxu0 %vm305_vm2, %v2326_v4  ;;  %2290 = vmatprep.mubr.msk.bf16.mxu1 %vm305_vm2, %v2334_v8  ;;  %v2337_v12 = vld [vmem:[%s2387_s18 + $0x58] sm:$0xff]   ;;  %v2338_v14 = vld [vmem:[%s2387_s18 + $0x60] sm:$0xff]   ;;  %v2339_v16 = vld [vmem:[%s2387_s18 + $0x68] sm:$0xff]  }
  0x17   : > { %v2332_v17 = vld [vmem:[%s2387_s18 + $0x30] sm:$0xff]   ;;  %v2333_v19 = vld [vmem:[%s2387_s18 + $0x38] sm:$0xff]   ;;  %v2435_v21 = vld [vmem:[%s3479_s2] ss:$0 sm:$0xff] }
  0x18   : > { %2271 = vmatpush3.bf16.msra.mxu0 %v2324_v2  ;;  %2310 = vmatpush3.bf16.msra.mxu1 %v2324_v2  ;;  %v2340_v18 = vld [vmem:[%s2387_s18 + $0x70] sm:$0xff]   ;;  %v2341_v20 = vld [vmem:[%s2387_s18 + $0x78] sm:$0xff]  }
  0x19   : > { %2272 = vmatprep.subr.bf16.mxu0 %v2325_v5  ;;  %2308 = vmatprep.subr.bf16.mxu1 %v2325_v5 }
  0x1c   : > { %2273 = vmatpush3.bf16.msra.mxu0 %v2325_v5  ;;  %2311 = vmatpush3.bf16.msra.mxu1 %v2325_v5 }
  0x1f   : > { %2275 = vmatmul.mubr.msk.bf16.vlgmr.msra.gmra.mxu0 %vm305_vm2, %v2327_v6  ;;  %2291 = vmatmul.mubr.msk.bf16.vlgmr.msra.gmra.mxu1 %vm305_vm2, %v2335_v9 }
  0x20   : > { %2278 = vmatprep.mubr.msk.bf16.mxu0 %vm305_vm2, %v2328_v7  ;;  %2294 = vmatprep.mubr.msk.bf16.mxu1 %vm305_vm2, %v2336_v10 }
  0x27   : > { %2279 = vmatmul.mubr.msk.bf16.gmra.mxu0 %vm305_vm2, %v2329_v11  ;;  %2295 = vmatmul.mubr.msk.bf16.gmra.mxu1 %vm305_vm2, %v2337_v12 }
  0x28   : > { %2282 = vmatprep.mubr.msk.bf16.mxu0 %vm305_vm2, %v2330_v13  ;;  %2298 = vmatprep.mubr.msk.bf16.mxu1 %vm305_vm2, %v2338_v14 }
  0x2f   : > { %2283 = vmatmul.mubr.msk.bf16.gmra.mxu0 %vm305_vm2, %v2331_v15  ;;  %2299 = vmatmul.mubr.msk.bf16.gmra.mxu1 %vm305_vm2, %v2339_v16 }
  0x30   : > { %2286 = vmatprep.mubr.msk.bf16.mxu0 %vm305_vm2, %v2332_v17  ;;  %2302 = vmatprep.mubr.msk.bf16.mxu1 %vm305_vm2, %v2340_v18 }
  0x37   : > { %2287 = vmatmul.mubr.msk.bf16.gmra.mxu0 %vm305_vm2, %v2333_v19  ;;  %2303 = vmatmul.mubr.msk.bf16.gmra.mxu1 %vm305_vm2, %v2341_v20 }
  0xdf   : > { %v2276_v22 = vpop.f32.mrf.mxu0  ;;  %v2292_v23 = vpop.f32.mrf.mxu1 }
  0xe0   : > { %v401_v24 = vadd.f32 %v2276_v22, %v2435_v21  ;;  %v2439_v25 = vadd.f32 %v2292_v23, %v2435_v21 }
  0xe1   : > { %v392_v26 = vpop.f32.mrf.mxu0  ;;  %v456_v27 = vpop.f32.mrf.mxu1 }
  0xe2   : > { %524 = vst.msk [vmem:[%s2441_s28 + $0x10] sm:$0xff] %vm521_vm3, %v401_v24  ;;  %v393_v28 = vadd.f32 %v2435_v21, %v392_v26  ;;  %540 = vst.msk [vmem:[%s2441_s28 + $0x90] sm:$0xff] %vm521_vm3, %v2439_v25  ;;  %v2450_v30 = vadd.f32 %v2435_v21, %v456_v27  ;;  %v630_v38 = vmul.f32 %v401_v24, %v401_v24  ;;  %v558_v46 = vsel %vm521_vm3, %v401_v24, 0.0 }
  0xe3   : > { %v2277_v29 = vpop.f32.mrf.mxu0  ;;  %v2293_v31 = vpop.f32.mrf.mxu1 }
  0xe4   : > { %522 = vst.msk [vmem:[%s2441_s28] sm:$0xff] %vm521_vm3, %v393_v28  ;;  %v404_v32 = vadd.f32 %v2277_v29, %v2435_v21  ;;  %538 = vst.msk [vmem:[%s2441_s28 + $0x80] sm:$0xff] %vm521_vm3, %v2450_v30  ;;  %v2459_v34 = vadd.f32 %v2293_v31, %v2435_v21  ;;  %v628_v36 = vmul.f32 %v393_v28, %v393_v28  ;;  %v555_v42 = vsel %vm521_vm3, %v393_v28, 0.0 }
  0xe5   : > { %v395_v33 = vpop.f32.mrf.mxu0  ;;  %v459_v35 = vpop.f32.mrf.mxu1  ;;  %v663_v59 = vsel %vm521_vm3, %v630_v38, 0.0 }
  0xe6   : > { %525 = vst.msk [vmem:[%s2441_s28 + $0x18] sm:$0xff] %vm521_vm3, %v404_v32  ;;  %v396_v37 = vadd.f32 %v2435_v21, %v395_v33  ;;  %541 = vst.msk [vmem:[%s2441_s28 + $0x98] sm:$0xff] %vm521_vm3, %v2459_v34  ;;  %v2468_v40 = vadd.f32 %v2435_v21, %v459_v35  ;;  %v660_v50 = vsel %vm521_vm3, %v628_v36, 0.0  ;;  %v631_v51 = vmul.f32 %v404_v32, %v404_v32 }
  0xe7   : > { %v2280_v39 = vpop.f32.mrf.mxu0  ;;  %v2296_v41 = vpop.f32.mrf.mxu1  ;;  %v560_v60 = vsel %vm521_vm3, %v404_v32, 0.0 }
  0xe8   : > { %523 = vst.msk [vmem:[%s2441_s28 + $0x8] sm:$0xff] %vm521_vm3, %v396_v37  ;;  %v556_v43 = vsel %vm521_vm3, %v396_v37, 0.0  ;;  %v629_v44 = vmul.f32 %v396_v37, %v396_v37  ;;  %v417_v45 = vadd.f32 %v2280_v39, %v2435_v21  ;;  %539 = vst.msk [vmem:[%s2441_s28 + $0x88] sm:$0xff] %vm521_vm3, %v2468_v40  ;;  %v2485_v57 = vadd.f32 %v2296_v41, %v2435_v21 }
  0xe9   : > { %v557_v47 = vadd.f32 %v556_v43, %v555_v42  ;;  %v408_v48 = vpop.f32.mrf.mxu0  ;;  %v472_v49 = vpop.f32.mrf.mxu1  ;;  %v665_v3 = vsel %vm521_vm3, %v631_v51, 0.0 }
  0xea   : > { %v661_v52 = vsel %vm521_vm3, %v629_v44, 0.0  ;;  %528 = vst.msk [vmem:[%s2441_s28 + $0x30] sm:$0xff] %vm521_vm3, %v417_v45  ;;  %v409_v53 = vadd.f32 %v2435_v21, %v408_v48  ;;  %544 = vst.msk [vmem:[%s2441_s28 + $0xb0] sm:$0xff] %vm521_vm3, %v2485_v57  ;;  %v634_v6 = vmul.f32 %v417_v45, %v417_v45  ;;  %v2501_v10 = vadd.f32 %v2435_v21, %v472_v49 }
  0xeb   : > { %v559_v54 = vadd.f32 %v558_v46, %v557_v47  ;;  %v662_v55 = vadd.f32 %v661_v52, %v660_v50  ;;  %v2281_v56 = vpop.f32.mrf.mxu0  ;;  %v2297_v58 = vpop.f32.mrf.mxu1  ;;  %v566_v20 = vsel %vm521_vm3, %v417_v45, 0.0 }
  0xec   : > { %526 = vst.msk [vmem:[%s2441_s28 + $0x20] sm:$0xff] %vm521_vm3, %v409_v53  ;;  %v632_v61 = vmul.f32 %v409_v53, %v409_v53  ;;  %v420_v62 = vadd.f32 %v2281_v56, %v2435_v21  ;;  %v562_v4 = vsel %vm521_vm3, %v409_v53, 0.0  ;;  %542 = vst.msk [vmem:[%s2441_s28 + $0xa0] sm:$0xff] %vm521_vm3, %v2501_v10  ;;  %v2519_v29 = vadd.f32 %v2297_v58, %v2435_v21 }
  0xed   : > { %v664_v63 = vadd.f32 %v663_v59, %v662_v55  ;;  %v561_v0 = vadd.f32 %v560_v60, %v559_v54  ;;  %v411_v1 = vpop.f32.mrf.mxu0  ;;  %v475_v2 = vpop.f32.mrf.mxu1  ;;  %v671_v32 = vsel %vm521_vm3, %v634_v6, 0.0 }
  0xee   : > { %529 = vst.msk [vmem:[%s2441_s28 + $0x38] sm:$0xff] %vm521_vm3, %v420_v62  ;;  %v412_v5 = vadd.f32 %v2435_v21, %v411_v1  ;;  %v667_v12 = vsel %vm521_vm3, %v632_v61, 0.0  ;;  %v635_v22 = vmul.f32 %v420_v62, %v420_v62  ;;  %v568_v33 = vsel %vm521_vm3, %v420_v62, 0.0  ;;  %545 = vst.msk [vmem:[%s2441_s28 + $0xb8] sm:$0xff] %vm521_vm3, %v2519_v29 }
  0xef   : > { %v563_v7 = vadd.f32 %v562_v4, %v561_v0  ;;  %v666_v8 = vadd.f32 %v665_v3, %v664_v63  ;;  %v2284_v9 = vpop.f32.mrf.mxu0  ;;  %v2300_v11 = vpop.f32.mrf.mxu1  ;;  %v2535_v49 = vadd.f32 %v2435_v21, %v475_v2 }
  0xf0   : > { %527 = vst.msk [vmem:[%s2441_s28 + $0x28] sm:$0xff] %vm521_vm3, %v412_v5  ;;  %v564_v13 = vsel %vm521_vm3, %v412_v5, 0.0  ;;  %v633_v14 = vmul.f32 %v412_v5, %v412_v5  ;;  %v433_v15 = vadd.f32 %v2284_v9, %v2435_v21  ;;  %v673_v42 = vsel %vm521_vm3, %v635_v22, 0.0 }
  0xf1   : > { %v668_v16 = vadd.f32 %v667_v12, %v666_v8  ;;  %v565_v17 = vadd.f32 %v564_v13, %v563_v7  ;;  %v424_v18 = vpop.f32.mrf.mxu0  ;;  %v2511_v19 = vpop.f32.mrf.mxu1  ;;  %543 = vst.msk [vmem:[%s2441_s28 + $0xa8] sm:$0xff] %vm521_vm3, %v2535_v49  ;;  %v2551_v2 = vadd.f32 %v2300_v11, %v2435_v21 }
  0xf2   : > { %v669_v23 = vsel %vm521_vm3, %v633_v14, 0.0  ;;  %532 = vst.msk [vmem:[%s2441_s28 + $0x50] sm:$0xff] %vm521_vm3, %v433_v15  ;;  %v425_v24 = vadd.f32 %v2435_v21, %v424_v18  ;;  %v638_v45 = vmul.f32 %v433_v15, %v433_v15  ;;  %v574_v59 = vsel %vm521_vm3, %v433_v15, 0.0 }
  0xf3   : > { %v567_v26 = vadd.f32 %v566_v20, %v565_v17  ;;  %v670_v27 = vadd.f32 %v669_v23, %v668_v16  ;;  %v2285_v28 = vpop.f32.mrf.mxu0  ;;  %v2301_v31 = vpop.f32.mrf.mxu1  ;;  %548 = vst.msk [vmem:[%s2441_s28 + $0xd0] sm:$0xff] %vm521_vm3, %v2551_v2  ;;  %v2568_v18 = vadd.f32 %v2435_v21, %v2511_v19 }
  0xf4   : > { %530 = vst.msk [vmem:[%s2441_s28 + $0x40] sm:$0xff] %vm521_vm3, %v425_v24  ;;  %v636_v35 = vmul.f32 %v425_v24, %v425_v24  ;;  %v436_v36 = vadd.f32 %v2285_v28, %v2435_v21  ;;  %v570_v43 = vsel %vm521_vm3, %v425_v24, 0.0  ;;  %v679_v3 = vsel %vm521_vm3, %v638_v45, 0.0 }
  0xf5   : > { %v672_v37 = vadd.f32 %v671_v32, %v670_v27  ;;  %v569_v38 = vadd.f32 %v568_v33, %v567_v26  ;;  %v427_v39 = vpop.f32.mrf.mxu0  ;;  %v491_v41 = vpop.f32.mrf.mxu1  ;;  %v2575_v24 = vadd.f32 %v2301_v31, %v2435_v21  ;;  %546 = vst.msk [vmem:[%s2441_s28 + $0xc0] sm:$0xff] %vm521_vm3, %v2568_v18 }
  0xf6   : > { %533 = vst.msk [vmem:[%s2441_s28 + $0x58] sm:$0xff] %vm521_vm3, %v436_v36  ;;  %v428_v44 = vadd.f32 %v2435_v21, %v427_v39  ;;  %v675_v50 = vsel %vm521_vm3, %v636_v35, 0.0  ;;  %v639_v60 = vmul.f32 %v436_v36, %v436_v36  ;;  %v576_v4 = vsel %vm521_vm3, %v436_v36, 0.0 }
  0xf7   : > { %v571_v46 = vadd.f32 %v570_v43, %v569_v38  ;;  %v674_v47 = vadd.f32 %v673_v42, %v672_v37  ;;  %v2288_v48 = vpop.f32.mrf.mxu0  ;;  %v2304_v54 = vpop.f32.mrf.mxu1  ;;  %549 = vst.msk [vmem:[%s2441_s28 + $0xd8] sm:$0xff] %vm521_vm3, %v2575_v24  ;;  %v2586_v35 = vadd.f32 %v2435_v21, %v491_v41  ;;  %v644_v42 = vmul.f32 %v2450_v30, %v2450_v30 }
  0xf8   : > { %531 = vst.msk [vmem:[%s2441_s28 + $0x48] sm:$0xff] %vm521_vm3, %v428_v44  ;;  %v572_v51 = vsel %vm521_vm3, %v428_v44, 0.0  ;;  %v637_v52 = vmul.f32 %v428_v44, %v428_v44  ;;  %v449_v53 = vadd.f32 %v2288_v48, %v2435_v21  ;;  %v681_v11 = vsel %vm521_vm3, %v639_v60, 0.0 }
  0xf9   : > { %v676_v55 = vadd.f32 %v675_v50, %v674_v47  ;;  %v573_v56 = vadd.f32 %v572_v51, %v571_v46  ;;  %v440_v58 = vpop.f32.mrf.mxu0  ;;  %v504_v7 = vpop.f32.mrf.mxu1  ;;  %v2589_v37 = vadd.f32 %v2304_v54, %v2435_v21  ;;  %547 = vst.msk [vmem:[%s2441_s28 + $0xc8] sm:$0xff] %vm521_vm3, %v2586_v35  ;;  %v586_v47 = vsel %vm521_vm3, %v2450_v30, 0.0 }
  0xfa   : > { %v677_v61 = vsel %vm521_vm3, %v637_v52, 0.0  ;;  %536 = vst.msk [vmem:[%s2441_s28 + $0x70] sm:$0xff] %vm521_vm3, %v449_v53  ;;  %v441_v62 = vadd.f32 %v2435_v21, %v440_v58  ;;  %v642_v15 = vmul.f32 %v449_v53, %v449_v53  ;;  %v582_v19 = vsel %vm521_vm3, %v449_v53, 0.0 }
  0xfb   : > { %v575_v63 = vadd.f32 %v574_v59, %v573_v56  ;;  %v678_v0 = vadd.f32 %v677_v61, %v676_v55  ;;  %v2289_v1 = vpop.f32.mrf.mxu0  ;;  %v2305_v26 = vpop.f32.mrf.mxu1  ;;  %v2599_v43 = vadd.f32 %v2435_v21, %v504_v7  ;;  %552 = vst.msk [vmem:[%s2441_s28 + $0xf0] sm:$0xff] %vm521_vm3, %v2589_v37  ;;  %v645_v48 = vmul.f32 %v2468_v40, %v2468_v40 }
  0xfc   : > { %534 = vst.msk [vmem:[%s2441_s28 + $0x60] sm:$0xff] %vm521_vm3, %v441_v62  ;;  %v640_v5 = vmul.f32 %v441_v62, %v441_v62  ;;  %v452_v6 = vadd.f32 %v2289_v1, %v2435_v21  ;;  %v578_v13 = vsel %vm521_vm3, %v441_v62, 0.0  ;;  %v687_v38 = vsel %vm521_vm3, %v642_v15, 0.0 }
  0xfd   : > { %v680_v8 = vadd.f32 %v679_v3, %v678_v0  ;;  %v577_v9 = vadd.f32 %v576_v4, %v575_v63  ;;  %v443_v12 = vpop.f32.mrf.mxu0  ;;  %v507_v41 = vpop.f32.mrf.mxu1  ;;  %550 = vst.msk [vmem:[%s2441_s28 + $0xe0] sm:$0xff] %vm521_vm3, %v2599_v43  ;;  %v2613_v50 = vadd.f32 %v2305_v26, %v2435_v21  ;;  %v646_v54 = vmul.f32 %v2439_v25, %v2439_v25 }
  0xfe   : > { %537 = vst.msk [vmem:[%s2441_s28 + $0x78] sm:$0xff] %vm521_vm3, %v452_v6  ;;  %v444_v14 = vadd.f32 %v2435_v21, %v443_v12  ;;  %v683_v20 = vsel %vm521_vm3, %v640_v5, 0.0  ;;  %v643_v32 = vmul.f32 %v452_v6, %v452_v6  ;;  %v584_v39 = vsel %vm521_vm3, %v452_v6, 0.0 }
  0xff   : > { %v579_v16 = vadd.f32 %v578_v13, %v577_v9  ;;  %v682_v17 = vadd.f32 %v681_v11, %v680_v8  ;;  %v2616_v53 = vadd.f32 %v2435_v21, %v507_v41  ;;  %v691_v55 = vsel %vm521_vm3, %v644_v42, 0.0  ;;  %553 = vst.msk [vmem:[%s2441_s28 + $0xf8] sm:$0xff] %vm521_vm3, %v2613_v50 }
 0x100   : > { %535 = vst.msk [vmem:[%s2441_s28 + $0x68] sm:$0xff] %vm521_vm3, %v444_v14  ;;  %v580_v22 = vsel %vm521_vm3, %v444_v14, 0.0  ;;  %v641_v23 = vmul.f32 %v444_v14, %v444_v14  ;;  %v689_v46 = vsel %vm521_vm3, %v643_v32, 0.0  ;;  %v588_v30 = vsel %vm521_vm3, %v2468_v40, 0.0 }
 0x101   : > { %v684_v27 = vadd.f32 %v683_v20, %v682_v17  ;;  %v581_v28 = vadd.f32 %v580_v22, %v579_v16  ;;  %551 = vst.msk [vmem:[%s2441_s28 + $0xe8] sm:$0xff] %vm521_vm3, %v2616_v53  ;;  %v590_v21 = vsel %vm521_vm3, %v2439_v25, 0.0  ;;  %v647_v59 = vmul.f32 %v2459_v34, %v2459_v34 }
 0x102   : > { %v685_v33 = vsel %vm521_vm3, %v641_v23, 0.0  ;;  %v693_v60 = vsel %vm521_vm3, %v645_v48, 0.0  ;;  %v695_v40 = vsel %vm521_vm3, %v646_v54, 0.0  ;;  %v592_v63 = vsel %vm521_vm3, %v2459_v34, 0.0 }
 0x103   : > { %v583_v31 = vadd.f32 %v582_v19, %v581_v28  ;;  %v686_v36 = vadd.f32 %v685_v33, %v684_v27  ;;  %v648_v0 = vmul.f32 %v2501_v10, %v2501_v10  ;;  %v697_v4 = vsel %vm521_vm3, %v647_v59, 0.0 }
 0x104   : > { %v594_v25 = vsel %vm521_vm3, %v2501_v10, 0.0  ;;  %v649_v5 = vmul.f32 %v2535_v49, %v2535_v49  ;;  %v650_v8 = vmul.f32 %v2485_v57, %v2485_v57  ;;  %v596_v9 = vsel %vm521_vm3, %v2535_v49, 0.0 }
 0x105   : > { %v688_v44 = vadd.f32 %v687_v38, %v686_v36  ;;  %v585_v45 = vadd.f32 %v584_v39, %v583_v31  ;;  %v699_v34 = vsel %vm521_vm3, %v648_v0, 0.0  ;;  %v598_v13 = vsel %vm521_vm3, %v2485_v57, 0.0 }
 0x106   : > { %v651_v10 = vmul.f32 %v2519_v29, %v2519_v29  ;;  %v701_v14 = vsel %vm521_vm3, %v649_v5, 0.0  ;;  %v703_v17 = vsel %vm521_vm3, %v650_v8, 0.0  ;;  %v600_v20 = vsel %vm521_vm3, %v2519_v29, 0.0 }
 0x107   : > { %v587_v51 = vadd.f32 %v586_v47, %v585_v45  ;;  %v690_v52 = vadd.f32 %v689_v46, %v688_v44  ;;  %v652_v49 = vmul.f32 %v2568_v18, %v2568_v18  ;;  %v602_v57 = vsel %vm521_vm3, %v2568_v18, 0.0 }
 0x108   : > { %v705_v26 = vsel %vm521_vm3, %v651_v10, 0.0  ;;  %v653_v27 = vmul.f32 %v2586_v35, %v2586_v35  ;;  %v654_v32 = vmul.f32 %v2551_v2, %v2551_v2  ;;  %v604_v33 = vsel %vm521_vm3, %v2586_v35, 0.0 }
 0x109   : > { %v589_v56 = vadd.f32 %v588_v30, %v587_v51  ;;  %v692_v58 = vadd.f32 %v691_v55, %v690_v52  ;;  %v707_v29 = vsel %vm521_vm3, %v652_v49, 0.0  ;;  %v606_v38 = vsel %vm521_vm3, %v2551_v2, 0.0 }
 0x10a   : > { %v655_v18 = vmul.f32 %v2575_v24, %v2575_v24  ;;  %v709_v39 = vsel %vm521_vm3, %v653_v27, 0.0  ;;  %v711_v44 = vsel %vm521_vm3, %v654_v32, 0.0  ;;  %v608_v45 = vsel %vm521_vm3, %v2575_v24, 0.0 }
 0x10b   : > { %v591_v61 = vadd.f32 %v590_v21, %v589_v56  ;;  %v694_v62 = vadd.f32 %v693_v60, %v692_v58  ;;  %v656_v35 = vmul.f32 %v2599_v43, %v2599_v43  ;;  %v610_v2 = vsel %vm521_vm3, %v2599_v43, 0.0 }
 0x10c   : > { %v713_v48 = vsel %vm521_vm3, %v655_v18, 0.0  ;;  %v657_v51 = vmul.f32 %v2616_v53, %v2616_v53  ;;  %v658_v55 = vmul.f32 %v2589_v37, %v2589_v37  ;;  %v612_v30 = vsel %vm521_vm3, %v2616_v53, 0.0 }
 0x10d   : > { %v696_v1 = vadd.f32 %v695_v40, %v694_v62  ;;  %v593_v3 = vadd.f32 %v592_v63, %v591_v61  ;;  %v715_v24 = vsel %vm521_vm3, %v656_v35, 0.0  ;;  %v614_v21 = vsel %vm521_vm3, %v2589_v37, 0.0 }
 0x10e   : > { %v659_v43 = vmul.f32 %v2613_v50, %v2613_v50  ;;  %v717_v59 = vsel %vm521_vm3, %v657_v51, 0.0  ;;  %v719_v62 = vsel %vm521_vm3, %v658_v55, 0.0  ;;  %v616_v40 = vsel %vm521_vm3, %v2613_v50, 0.0 }
 0x10f   : > { %v595_v6 = vadd.f32 %v594_v25, %v593_v3  ;;  %v698_v7 = vadd.f32 %v697_v4, %v696_v1 }
 0x110   : > { %v721_v53 = vsel %vm521_vm3, %v659_v43, 0.0 }
 0x111   : > { %v700_v12 = vadd.f32 %v699_v34, %v698_v7  ;;  %v597_v11 = vadd.f32 %v596_v9, %v595_v6  ;;  %v554_v9 = vld [vmem:[#allocation3] sm:$0x1] }
 0x113   : > { %v599_v15 = vadd.f32 %v598_v13, %v597_v11  ;;  %v702_v16 = vadd.f32 %v701_v14, %v700_v12  ;;  %v627_v13 = vld [vmem:[#allocation4] sm:$0x1] }
 0x115   : > { %v704_v22 = vadd.f32 %v703_v17, %v702_v16  ;;  %v601_v23 = vadd.f32 %v600_v20, %v599_v15 }
 0x117   : > { %v603_v28 = vadd.f32 %v602_v57, %v601_v23  ;;  %v706_v19 = vadd.f32 %v705_v26, %v704_v22 }
 0x119   : > { %v708_v31 = vadd.f32 %v707_v29, %v706_v19  ;;  %v605_v36 = vadd.f32 %v604_v33, %v603_v28 }
 0x11b   : > { %v607_v42 = vadd.f32 %v606_v38, %v605_v36  ;;  %v710_v41 = vadd.f32 %v709_v39, %v708_v31 }
 0x11d   : > { %v712_v46 = vadd.f32 %v711_v44, %v710_v41  ;;  %v609_v47 = vadd.f32 %v608_v45, %v607_v42 }
 0x11f   : > { %v611_v52 = vadd.f32 %v610_v2, %v609_v47  ;;  %v714_v54 = vadd.f32 %v713_v48, %v712_v46 }
 0x121   : > { %v716_v56 = vadd.f32 %v715_v24, %v714_v54  ;;  %v613_v58 = vadd.f32 %v612_v30, %v611_v52 }
 0x123   : > { %v615_v60 = vadd.f32 %v614_v21, %v613_v58  ;;  %v718_v61 = vadd.f32 %v717_v59, %v716_v56 }
 0x125   : > { %v617_v63 = vadd.f32 %v616_v40, %v615_v60  ;;  %v720_v0 = vadd.f32 %v719_v62, %v718_v61 }
 0x127   : > { %v618_v1 = vrot.slane %v617_v63, 4  ;;  %v722_v3 = vadd.f32 %v721_v53, %v720_v0 }
 0x129   : > { %v619_v4 = vadd.f32 %v618_v1, %v617_v63  ;;  %v723_v37 = vrot.slane %v722_v3, 4 }
 0x12b   : > { %v620_v25 = vrot.slane %v619_v4, 2  ;;  %v724_v5 = vadd.f32 %v723_v37, %v722_v3 }
 0x12d   : > { %v621_v6 = vadd.f32 %v620_v25, %v619_v4  ;;  %v725_v7 = vrot.slane %v724_v5, 2 }
 0x12f   : > { %v622_v8 = vrot.slane %v621_v6, 1  ;;  %v726_v34 = vadd.f32 %v725_v7, %v724_v5 }
 0x131   : > { %v623_v12 = vadd.f32 %v622_v8, %v621_v6  ;;  %v727_v11 = vrot.slane %v726_v34, 1 }
 0x133   : > { %v624_v50 = vadd.f32 %v623_v12, %v554_v9  ;;  %v728_v10 = vadd.f32 %v727_v11, %v726_v34  ;;  %734 = sbr.rel (%p1990_p5) target bundleno = 492 (0x1ec), region = 40 }
 0x135   : > { %626 = vst.msk [vmem:[#allocation3] sm:$0x1] %vm625_vm4, %v624_v50  ;;  %v729_v14 = vadd.f32 %v728_v10, %v627_v13 }
 0x137   : > { %730 = vst.msk [vmem:[#allocation4] sm:$0x1] %vm625_vm4, %v729_v14 }
 0x138   : > { %v737_v16 = vld [vmem:[%s3479_s2] sm:$0x1]  ;;  %v880_v29 = vlaneseq  ;;  %v752_v39 = vld [vmem:[#allocation2 + $0x8] sm:$0xff]  ;;  %v753_v42 = vld [vmem:[#allocation2 + $0x10] sm:$0xff]  ;;  %vm1787_vm5 = vcmask 191488  }
 0x139   : > { %v738_v17 = vmul.f32 21.0, %v737_v16  ;;  %v751_v38 = vld [vmem:[#allocation2] sm:$0xff]  ;;  %v754_v41 = vld [vmem:[#allocation2 + $0x18] sm:$0xff]  ;;  %v756_v46 = vld [vmem:[#allocation2 + $0x28] sm:$0xff] }
 0x13a   : > { %v881_v33 = vshrl.u32 %v880_v29, 7  ;;  %v755_v35 = vld [vmem:[#allocation2 + $0x20] sm:$0xff]  ;;  %v757_v47 = vld [vmem:[#allocation2 + $0x30] sm:$0xff]  ;;  %v758_v48 = vld [vmem:[#allocation2 + $0x38] sm:$0xff] }
 0x13b   : > { %v740_v22 = vmul.f32 %v738_v17, %v737_v16  ;;  %v759_v3 = vld [vmem:[#allocation2 + $0x40] sm:$0xff]  ;;  %v760_v4 = vld [vmem:[#allocation2 + $0x48] sm:$0xff]  ;;  %v761_v7 = vld [vmem:[#allocation2 + $0x50] sm:$0xff] }
 0x13c   : > { %v735_v15 = vld [vmem:[#allocation3] sm:$0x1]  ;;  %v882_v36 = vsub.s32 0, %v881_v33  ;;  %v762_v8 = vld [vmem:[#allocation2 + $0x58] sm:$0xff]  ;;  %v764_v50 = vld [vmem:[#allocation2 + $0x68] sm:$0xff] }
 0x13d   : > { %v739_v49 = vsub.f32 %v735_v15, %v738_v17  ;;  %v763_v13 = vld [vmem:[#allocation2 + $0x60] sm:$0xff]  ;;  %v765_v10 = vld [vmem:[#allocation2 + $0x70] sm:$0xff] }
 0x13e   : > { %v736_v20 = vld [vmem:[#allocation4] sm:$0x1] }
 0x13f   : > { %v741_v23 = vsub.f32 %v736_v20, %v740_v22  ;;  %v742_v26 = vmul.f32 0.000997009, %v739_v49  ;;  %v766_v20 = vld [vmem:[#allocation2 + $0x78] sm:$0xff] }
 0x141   : > { %v743_v57 = vmul.f32 0.000997009, %v741_v23  ;;  %v744_v27 = vmul.f32 %v742_v26, %v742_v26  ;;  %v749_v31 = vsub.f32 0.0, %v742_v26 }
 0x143   : > { %v745_v28 = vsub.f32 %v743_v57, %v744_v27 }
 0x145   : > { %v746_v19 = vmax.f32 %v745_v28, 0.0 }
 0x147   : > { %v747_v32 = vadd.f32 1e-05, %v746_v19 }
 0x149   : > { %2342 = vrsqrt.f32 %v747_v32 }
 0x156   : > { %v2343_v18 = vpop.eup %2342 }
 0x157   : > { %v750_v44 = vmul.f32 %v2343_v18, %v749_v31  ;;  %v2702_v45 = vrot.slane %v2343_v18, %v882_v36 }
 0x159   : > { %v885_v2 = vmul.f32 %v2702_v45, %v751_v38  ;;  %v2705_v51 = vrot.slane %v750_v44, %v882_v36  ;;  %v886_v52 = vmul.f32 %v2702_v45, %v752_v39  ;;  %v887_v54 = vmul.f32 %v2702_v45, %v753_v42 }
 0x15a   : > { %v888_v55 = vmul.f32 %v2702_v45, %v754_v41  ;;  %v889_v24 = vmul.f32 %v2702_v45, %v755_v35  ;;  %v890_v30 = vmul.f32 %v2702_v45, %v756_v46  ;;  %v891_v56 = vmul.f32 %v2702_v45, %v757_v47  ;;  %v767_v46 = vld [vmem:[#allocation2 + $0x80] sm:$0xff]  ;;  %v768_v47 = vld [vmem:[#allocation2 + $0x88] sm:$0xff] }
 0x15b   : > { %v1019_v58 = vadd.f32 %v2705_v51, %v885_v2  ;;  %v1020_v21 = vadd.f32 %v2705_v51, %v886_v52  ;;  %v1021_v43 = vadd.f32 %v2705_v51, %v887_v54  ;;  %v892_v59 = vmul.f32 %v2702_v45, %v758_v48 }
 0x15c   : > { %v1022_v60 = vadd.f32 %v2705_v51, %v888_v55  ;;  %v1023_v61 = vadd.f32 %v2705_v51, %v889_v24  ;;  %v1024_v62 = vadd.f32 %v2705_v51, %v890_v30  ;;  %v1025_v40 = vadd.f32 %v2705_v51, %v891_v56  ;;  %v769_v55 = vld [vmem:[#allocation2 + $0x90] sm:$0xff]  ;;  %v770_v24 = vld [vmem:[#allocation2 + $0x98] sm:$0xff] }
 0x15d   : > { %v1147_v63 = vmax.f32 %v1019_v58, 0.0  ;;  %v1148_v0 = vmax.f32 %v1020_v21, 0.0  ;;  %v1149_v53 = vmax.f32 %v1021_v43, 0.0  ;;  %v1026_v1 = vadd.f32 %v2705_v51, %v892_v59  ;;  %v771_v43 = vld [vmem:[#allocation2 + $0xa0] sm:$0xff]  ;;  %v772_v59 = vld [vmem:[#allocation2 + $0xa8] sm:$0xff] }
 0x15e   : > { %v1150_v37 = vmax.f32 %v1022_v60, 0.0  ;;  %v1151_v25 = vmax.f32 %v1023_v61, 0.0  ;;  %v1152_v5 = vmax.f32 %v1024_v62, 0.0  ;;  %v1153_v6 = vmax.f32 %v1025_v40, 0.0  ;;  %v773_v60 = vld [vmem:[#allocation2 + $0xb0] sm:$0xff] }
 0x15f   : > { %v2121_v34 = vpack.c.bf16 %v1147_v63, %v1147_v63  ;;  %v2122_v9 = vpack.c.bf16 %v1148_v0, %v1148_v0  ;;  %v2123_v12 = vpack.c.bf16 %v1149_v53, %v1149_v53  ;;  %v1154_v11 = vmax.f32 %v1026_v1, 0.0  ;;  %v774_v0 = vld [vmem:[#allocation2 + $0xb8] sm:$0xff] }
 0x160   : > { %v2124_v14 = vpack.c.bf16 %v1150_v37, %v1150_v37  ;;  %v2125_v15 = vpack.c.bf16 %v1151_v25, %v1151_v25  ;;  %v2126_v16 = vpack.c.bf16 %v1152_v5, %v1152_v5  ;;  %v2127_v17 = vpack.c.bf16 %v1153_v6, %v1153_v6 }
 0x161   : > { %1788 = vst.msk [vmem:[%s3480_s3] sm:$0xf] %vm1787_vm5, %v2121_v34  ;;  %1789 = vst.msk [vmem:[%s3480_s3 + $0x4] sm:$0xf] %vm1787_vm5, %v2122_v9  ;;  %v2128_v49 = vpack.c.bf16 %v1154_v11, %v1154_v11  ;;  %v893_v22 = vmul.f32 %v2702_v45, %v759_v3  ;;  %v894_v23 = vmul.f32 %v2702_v45, %v760_v4 }
 0x162   : > { %1790 = vst.msk [vmem:[%s3480_s3 + $0x8] sm:$0xf] %vm1787_vm5, %v2123_v12  ;;  %v895_v26 = vmul.f32 %v2702_v45, %v761_v7  ;;  %1791 = vst.msk [vmem:[%s3480_s3 + $0xc] sm:$0xf] %vm1787_vm5, %v2124_v14  ;;  %v896_v57 = vmul.f32 %v2702_v45, %v762_v8  ;;  %v897_v27 = vmul.f32 %v2702_v45, %v763_v13 }
 0x163   : > { %1792 = vst.msk [vmem:[%s3480_s3 + $0x10] sm:$0xf] %vm1787_vm5, %v2125_v15  ;;  %1793 = vst.msk [vmem:[%s3480_s3 + $0x14] sm:$0xf] %vm1787_vm5, %v2126_v16  ;;  %v898_v28 = vmul.f32 %v2702_v45, %v764_v50  ;;  %v899_v19 = vmul.f32 %v2702_v45, %v765_v10  ;;  %v1027_v32 = vadd.f32 %v2705_v51, %v893_v22 }
 0x164   : > { %1794 = vst.msk [vmem:[%s3480_s3 + $0x18] sm:$0xf] %vm1787_vm5, %v2127_v17  ;;  %1795 = vst.msk [vmem:[%s3480_s3 + $0x1c] sm:$0xf] %vm1787_vm5, %v2128_v49  ;;  %v1028_v29 = vadd.f32 %v2705_v51, %v894_v23  ;;  %v1029_v33 = vadd.f32 %v2705_v51, %v895_v26  ;;  %v900_v31 = vmul.f32 %v2702_v45, %v766_v20  ;;  %v775_v17 = vld [vmem:[#allocation2 + $0xc0] sm:$0xff]  ;;  %v776_v20 = vld [vmem:[#allocation2 + $0xc8] sm:$0xff] }
 0x165   : > { %v1030_v36 = vadd.f32 %v2705_v51, %v896_v57  ;;  %v1031_v38 = vadd.f32 %v2705_v51, %v897_v27  ;;  %v1032_v18 = vadd.f32 %v2705_v51, %v898_v28  ;;  %v1033_v39 = vadd.f32 %v2705_v51, %v899_v19  ;;  %v777_v57 = vld [vmem:[#allocation2 + $0xd0] sm:$0xff]  ;;  %v778_v27 = vld [vmem:[#allocation2 + $0xd8] sm:$0xff] }
 0x166   : > { %v1155_v42 = vmax.f32 %v1027_v32, 0.0  ;;  %v1156_v41 = vmax.f32 %v1028_v29, 0.0  ;;  %v1157_v44 = vmax.f32 %v1029_v33, 0.0  ;;  %v1034_v35 = vadd.f32 %v2705_v51, %v900_v31  ;;  %v779_v33 = vld [vmem:[#allocation2 + $0xe0] sm:$0xff]  ;;  %v780_v31 = vld [vmem:[#allocation2 + $0xe8] sm:$0xff] }
 0x167   : > { %v1158_v48 = vmax.f32 %v1030_v36, 0.0  ;;  %v1159_v2 = vmax.f32 %v1031_v38, 0.0  ;;  %v1160_v52 = vmax.f32 %v1032_v18, 0.0  ;;  %v1161_v54 = vmax.f32 %v1033_v39, 0.0  ;;  %v781_v36 = vld [vmem:[#allocation2 + $0xf0] sm:$0xff] }
 0x168   : > { %v2129_v30 = vpack.c.bf16 %v1155_v42, %v1155_v42  ;;  %v2130_v56 = vpack.c.bf16 %v1156_v41, %v1156_v41  ;;  %v2131_v58 = vpack.c.bf16 %v1157_v44, %v1157_v44  ;;  %v1162_v21 = vmax.f32 %v1034_v35, 0.0  ;;  %v782_v41 = vld [vmem:[#allocation2 + $0xf8] sm:$0xff] }
 0x169   : > { %v2132_v61 = vpack.c.bf16 %v1158_v48, %v1158_v48  ;;  %v2133_v62 = vpack.c.bf16 %v1159_v2, %v1159_v2  ;;  %v2134_v40 = vpack.c.bf16 %v1160_v52, %v1160_v52  ;;  %v2135_v63 = vpack.c.bf16 %v1161_v54, %v1161_v54 }
 0x16a   : > { %1796 = vst.msk [vmem:[%s3480_s3 + $0x20] sm:$0xf] %vm1787_vm5, %v2129_v30  ;;  %1797 = vst.msk [vmem:[%s3480_s3 + $0x24] sm:$0xf] %vm1787_vm5, %v2130_v56  ;;  %v2136_v53 = vpack.c.bf16 %v1162_v21, %v1162_v21  ;;  %v901_v1 = vmul.f32 %v2702_v45, %v767_v46  ;;  %v902_v3 = vmul.f32 %v2702_v45, %v768_v47 }
 0x16b   : > { %1798 = vst.msk [vmem:[%s3480_s3 + $0x28] sm:$0xf] %vm1787_vm5, %v2131_v58  ;;  %v903_v4 = vmul.f32 %v2702_v45, %v769_v55  ;;  %1799 = vst.msk [vmem:[%s3480_s3 + $0x2c] sm:$0xf] %vm1787_vm5, %v2132_v61  ;;  %v904_v37 = vmul.f32 %v2702_v45, %v770_v24  ;;  %v905_v25 = vmul.f32 %v2702_v45, %v771_v43 }
 0x16c   : > { %1800 = vst.msk [vmem:[%s3480_s3 + $0x30] sm:$0xf] %vm1787_vm5, %v2133_v62  ;;  %1801 = vst.msk [vmem:[%s3480_s3 + $0x34] sm:$0xf] %vm1787_vm5, %v2134_v40  ;;  %v906_v5 = vmul.f32 %v2702_v45, %v772_v59  ;;  %v907_v6 = vmul.f32 %v2702_v45, %v773_v60  ;;  %v1035_v7 = vadd.f32 %v2705_v51, %v901_v1 }
 0x16d   : > { %1802 = vst.msk [vmem:[%s3480_s3 + $0x38] sm:$0xf] %vm1787_vm5, %v2135_v63  ;;  %1803 = vst.msk [vmem:[%s3480_s3 + $0x3c] sm:$0xf] %vm1787_vm5, %v2136_v53  ;;  %v1036_v8 = vadd.f32 %v2705_v51, %v902_v3  ;;  %v1037_v34 = vadd.f32 %v2705_v51, %v903_v4  ;;  %v908_v9 = vmul.f32 %v2702_v45, %v774_v0  ;;  %v783_v63 = vld [vmem:[#allocation2 + $0x100] sm:$0xff]  ;;  %v784_v0 = vld [vmem:[#allocation2 + $0x108] sm:$0xff] }
 0x16e   : > { %v1038_v12 = vadd.f32 %v2705_v51, %v904_v37  ;;  %v1039_v11 = vadd.f32 %v2705_v51, %v905_v25  ;;  %v1040_v13 = vadd.f32 %v2705_v51, %v906_v5  ;;  %v1041_v50 = vadd.f32 %v2705_v51, %v907_v6  ;;  %v785_v37 = vld [vmem:[#allocation2 + $0x110] sm:$0xff]  ;;  %v786_v25 = vld [vmem:[#allocation2 + $0x118] sm:$0xff] }
 0x16f   : > { %v1163_v10 = vmax.f32 %v1035_v7, 0.0  ;;  %v1164_v14 = vmax.f32 %v1036_v8, 0.0  ;;  %v1165_v15 = vmax.f32 %v1037_v34, 0.0  ;;  %v1042_v16 = vadd.f32 %v2705_v51, %v908_v9  ;;  %v787_v34 = vld [vmem:[#allocation2 + $0x120] sm:$0xff]  ;;  %v788_v9 = vld [vmem:[#allocation2 + $0x128] sm:$0xff] }
 0x170   : > { %v1166_v49 = vmax.f32 %v1038_v12, 0.0  ;;  %v1167_v22 = vmax.f32 %v1039_v11, 0.0  ;;  %v1168_v23 = vmax.f32 %v1040_v13, 0.0  ;;  %v1169_v26 = vmax.f32 %v1041_v50, 0.0  ;;  %v789_v12 = vld [vmem:[#allocation2 + $0x130] sm:$0xff] }
 0x171   : > { %v2137_v28 = vpack.c.bf16 %v1163_v10, %v1163_v10  ;;  %v2138_v19 = vpack.c.bf16 %v1164_v14, %v1164_v14  ;;  %v2139_v32 = vpack.c.bf16 %v1165_v15, %v1165_v15  ;;  %v1170_v29 = vmax.f32 %v1042_v16, 0.0  ;;  %v790_v14 = vld [vmem:[#allocation2 + $0x138] sm:$0xff] }
 0x172   : > { %v2140_v38 = vpack.c.bf16 %v1166_v49, %v1166_v49  ;;  %v2141_v18 = vpack.c.bf16 %v1167_v22, %v1167_v22  ;;  %v2142_v39 = vpack.c.bf16 %v1168_v23, %v1168_v23  ;;  %v2143_v42 = vpack.c.bf16 %v1169_v26, %v1169_v26 }
 0x173   : > { %1804 = vst.msk [vmem:[%s3480_s3 + $0x40] sm:$0xf] %vm1787_vm5, %v2137_v28  ;;  %1805 = vst.msk [vmem:[%s3480_s3 + $0x44] sm:$0xf] %vm1787_vm5, %v2138_v19  ;;  %v2144_v44 = vpack.c.bf16 %v1170_v29, %v1170_v29  ;;  %v909_v35 = vmul.f32 %v2702_v45, %v775_v17  ;;  %v910_v46 = vmul.f32 %v2702_v45, %v776_v20 }
 0x174   : > { %1806 = vst.msk [vmem:[%s3480_s3 + $0x48] sm:$0xf] %vm1787_vm5, %v2139_v32  ;;  %v911_v47 = vmul.f32 %v2702_v45, %v777_v57  ;;  %1807 = vst.msk [vmem:[%s3480_s3 + $0x4c] sm:$0xf] %vm1787_vm5, %v2140_v38  ;;  %v912_v48 = vmul.f32 %v2702_v45, %v778_v27  ;;  %v913_v2 = vmul.f32 %v2702_v45, %v779_v33 }
 0x175   : > { %1808 = vst.msk [vmem:[%s3480_s3 + $0x50] sm:$0xf] %vm1787_vm5, %v2141_v18  ;;  %1809 = vst.msk [vmem:[%s3480_s3 + $0x54] sm:$0xf] %vm1787_vm5, %v2142_v39  ;;  %v914_v52 = vmul.f32 %v2702_v45, %v780_v31  ;;  %v915_v54 = vmul.f32 %v2702_v45, %v781_v36  ;;  %v1043_v55 = vadd.f32 %v2705_v51, %v909_v35 }
 0x176   : > { %1810 = vst.msk [vmem:[%s3480_s3 + $0x58] sm:$0xf] %vm1787_vm5, %v2143_v42  ;;  %1811 = vst.msk [vmem:[%s3480_s3 + $0x5c] sm:$0xf] %vm1787_vm5, %v2144_v44  ;;  %v1044_v24 = vadd.f32 %v2705_v51, %v910_v46  ;;  %v1045_v30 = vadd.f32 %v2705_v51, %v911_v47  ;;  %v916_v56 = vmul.f32 %v2702_v45, %v782_v41  ;;  %v791_v42 = vld [vmem:[#allocation2 + $0x140] sm:$0xff]  ;;  %v792_v41 = vld [vmem:[#allocation2 + $0x148] sm:$0xff] }
 0x177   : > { %v1046_v58 = vadd.f32 %v2705_v51, %v912_v48  ;;  %v1047_v21 = vadd.f32 %v2705_v51, %v913_v2  ;;  %v1048_v43 = vadd.f32 %v2705_v51, %v914_v52  ;;  %v1049_v59 = vadd.f32 %v2705_v51, %v915_v54  ;;  %v793_v48 = vld [vmem:[#allocation2 + $0x150] sm:$0xff]  ;;  %v794_v2 = vld [vmem:[#allocation2 + $0x158] sm:$0xff] }
 0x178   : > { %v1171_v60 = vmax.f32 %v1043_v55, 0.0  ;;  %v1172_v61 = vmax.f32 %v1044_v24, 0.0  ;;  %v1173_v62 = vmax.f32 %v1045_v30, 0.0  ;;  %v1050_v40 = vadd.f32 %v2705_v51, %v916_v56  ;;  %v795_v30 = vld [vmem:[#allocation2 + $0x160] sm:$0xff]  ;;  %v796_v56 = vld [vmem:[#allocation2 + $0x168] sm:$0xff] }
 0x179   : > { %v1174_v53 = vmax.f32 %v1046_v58, 0.0  ;;  %v1175_v1 = vmax.f32 %v1047_v21, 0.0  ;;  %v1176_v3 = vmax.f32 %v1048_v43, 0.0  ;;  %v1177_v4 = vmax.f32 %v1049_v59, 0.0  ;;  %v797_v58 = vld [vmem:[#allocation2 + $0x170] sm:$0xff] }
 0x17a   : > { %v2145_v5 = vpack.c.bf16 %v1171_v60, %v1171_v60  ;;  %v2146_v6 = vpack.c.bf16 %v1172_v61, %v1172_v61  ;;  %v2147_v7 = vpack.c.bf16 %v1173_v62, %v1173_v62  ;;  %v1178_v8 = vmax.f32 %v1050_v40, 0.0  ;;  %v798_v61 = vld [vmem:[#allocation2 + $0x178] sm:$0xff] }
 0x17b   : > { %v2148_v11 = vpack.c.bf16 %v1174_v53, %v1174_v53  ;;  %v2149_v13 = vpack.c.bf16 %v1175_v1, %v1175_v1  ;;  %v2150_v50 = vpack.c.bf16 %v1176_v3, %v1176_v3  ;;  %v2151_v10 = vpack.c.bf16 %v1177_v4, %v1177_v4 }
 0x17c   : > { %1812 = vst.msk [vmem:[%s3480_s3 + $0x60] sm:$0xf] %vm1787_vm5, %v2145_v5  ;;  %1813 = vst.msk [vmem:[%s3480_s3 + $0x64] sm:$0xf] %vm1787_vm5, %v2146_v6  ;;  %v2152_v15 = vpack.c.bf16 %v1178_v8, %v1178_v8  ;;  %v917_v16 = vmul.f32 %v2702_v45, %v783_v63  ;;  %v918_v17 = vmul.f32 %v2702_v45, %v784_v0 }
 0x17d   : > { %1814 = vst.msk [vmem:[%s3480_s3 + $0x68] sm:$0xf] %vm1787_vm5, %v2147_v7  ;;  %v919_v20 = vmul.f32 %v2702_v45, %v785_v37  ;;  %1815 = vst.msk [vmem:[%s3480_s3 + $0x6c] sm:$0xf] %vm1787_vm5, %v2148_v11  ;;  %v920_v49 = vmul.f32 %v2702_v45, %v786_v25  ;;  %v921_v22 = vmul.f32 %v2702_v45, %v787_v34 }
 0x17e   : > { %1816 = vst.msk [vmem:[%s3480_s3 + $0x70] sm:$0xf] %vm1787_vm5, %v2149_v13  ;;  %1817 = vst.msk [vmem:[%s3480_s3 + $0x74] sm:$0xf] %vm1787_vm5, %v2150_v50  ;;  %v922_v23 = vmul.f32 %v2702_v45, %v788_v9  ;;  %v923_v26 = vmul.f32 %v2702_v45, %v789_v12  ;;  %v1051_v57 = vadd.f32 %v2705_v51, %v917_v16 }
 0x17f   : > { %1818 = vst.msk [vmem:[%s3480_s3 + $0x78] sm:$0xf] %vm1787_vm5, %v2151_v10  ;;  %1819 = vst.msk [vmem:[%s3480_s3 + $0x7c] sm:$0xf] %vm1787_vm5, %v2152_v15  ;;  %v1052_v27 = vadd.f32 %v2705_v51, %v918_v17  ;;  %v1053_v28 = vadd.f32 %v2705_v51, %v919_v20  ;;  %v924_v19 = vmul.f32 %v2702_v45, %v790_v14  ;;  %v799_v10 = vld [vmem:[#allocation2 + $0x180] sm:$0xff]  ;;  %v800_v14 = vld [vmem:[#allocation2 + $0x188] sm:$0xff] }
 0x180   : > { %v1054_v32 = vadd.f32 %v2705_v51, %v920_v49  ;;  %v1055_v29 = vadd.f32 %v2705_v51, %v921_v22  ;;  %v1056_v33 = vadd.f32 %v2705_v51, %v922_v23  ;;  %v1057_v31 = vadd.f32 %v2705_v51, %v923_v26  ;;  %v801_v49 = vld [vmem:[#allocation2 + $0x190] sm:$0xff]  ;;  %v802_v22 = vld [vmem:[#allocation2 + $0x198] sm:$0xff] }
 0x181   : > { %v1179_v36 = vmax.f32 %v1051_v57, 0.0  ;;  %v1180_v38 = vmax.f32 %v1052_v27, 0.0  ;;  %v1181_v18 = vmax.f32 %v1053_v28, 0.0  ;;  %v1058_v39 = vadd.f32 %v2705_v51, %v924_v19  ;;  %v803_v28 = vld [vmem:[#allocation2 + $0x1a0] sm:$0xff]  ;;  %v804_v19 = vld [vmem:[#allocation2 + $0x1a8] sm:$0xff] }
 0x182   : > { %v1182_v44 = vmax.f32 %v1054_v32, 0.0  ;;  %v1183_v35 = vmax.f32 %v1055_v29, 0.0  ;;  %v1184_v46 = vmax.f32 %v1056_v33, 0.0  ;;  %v1185_v47 = vmax.f32 %v1057_v31, 0.0  ;;  %v805_v32 = vld [vmem:[#allocation2 + $0x1b0] sm:$0xff] }
 0x183   : > { %v2153_v52 = vpack.c.bf16 %v1179_v36, %v1179_v36  ;;  %v2154_v54 = vpack.c.bf16 %v1180_v38, %v1180_v38  ;;  %v2155_v55 = vpack.c.bf16 %v1181_v18, %v1181_v18  ;;  %v1186_v24 = vmax.f32 %v1058_v39, 0.0  ;;  %v806_v38 = vld [vmem:[#allocation2 + $0x1b8] sm:$0xff] }
 0x184   : > { %v2156_v21 = vpack.c.bf16 %v1182_v44, %v1182_v44  ;;  %v2157_v43 = vpack.c.bf16 %v1183_v35, %v1183_v35  ;;  %v2158_v59 = vpack.c.bf16 %v1184_v46, %v1184_v46  ;;  %v2159_v60 = vpack.c.bf16 %v1185_v47, %v1185_v47 }
 0x185   : > { %1820 = vst.msk [vmem:[%s3480_s3 + $0x80] sm:$0xf] %vm1787_vm5, %v2153_v52  ;;  %1821 = vst.msk [vmem:[%s3480_s3 + $0x84] sm:$0xf] %vm1787_vm5, %v2154_v54  ;;  %v2160_v62 = vpack.c.bf16 %v1186_v24, %v1186_v24  ;;  %v925_v40 = vmul.f32 %v2702_v45, %v791_v42  ;;  %v926_v63 = vmul.f32 %v2702_v45, %v792_v41 }
 0x186   : > { %1822 = vst.msk [vmem:[%s3480_s3 + $0x88] sm:$0xf] %vm1787_vm5, %v2155_v55  ;;  %v927_v0 = vmul.f32 %v2702_v45, %v793_v48  ;;  %1823 = vst.msk [vmem:[%s3480_s3 + $0x8c] sm:$0xf] %vm1787_vm5, %v2156_v21  ;;  %v928_v53 = vmul.f32 %v2702_v45, %v794_v2  ;;  %v929_v1 = vmul.f32 %v2702_v45, %v795_v30 }
 0x187   : > { %1824 = vst.msk [vmem:[%s3480_s3 + $0x90] sm:$0xf] %vm1787_vm5, %v2157_v43  ;;  %1825 = vst.msk [vmem:[%s3480_s3 + $0x94] sm:$0xf] %vm1787_vm5, %v2158_v59  ;;  %v930_v3 = vmul.f32 %v2702_v45, %v796_v56  ;;  %v931_v4 = vmul.f32 %v2702_v45, %v797_v58  ;;  %v1059_v37 = vadd.f32 %v2705_v51, %v925_v40 }
 0x188   : > { %1826 = vst.msk [vmem:[%s3480_s3 + $0x98] sm:$0xf] %vm1787_vm5, %v2159_v60  ;;  %1827 = vst.msk [vmem:[%s3480_s3 + $0x9c] sm:$0xf] %vm1787_vm5, %v2160_v62  ;;  %v1060_v25 = vadd.f32 %v2705_v51, %v926_v63  ;;  %v1061_v5 = vadd.f32 %v2705_v51, %v927_v0  ;;  %v932_v6 = vmul.f32 %v2702_v45, %v798_v61  ;;  %v807_v60 = vld [vmem:[#allocation2 + $0x1c0] sm:$0xff]  ;;  %v808_v61 = vld [vmem:[#allocation2 + $0x1c8] sm:$0xff] }
 0x189   : > { %v1062_v7 = vadd.f32 %v2705_v51, %v928_v53  ;;  %v1063_v8 = vadd.f32 %v2705_v51, %v929_v1  ;;  %v1064_v34 = vadd.f32 %v2705_v51, %v930_v3  ;;  %v1065_v9 = vadd.f32 %v2705_v51, %v931_v4  ;;  %v809_v53 = vld [vmem:[#allocation2 + $0x1d0] sm:$0xff]  ;;  %v810_v1 = vld [vmem:[#allocation2 + $0x1d8] sm:$0xff] }
 0x18a   : > { %v1187_v12 = vmax.f32 %v1059_v37, 0.0  ;;  %v1188_v11 = vmax.f32 %v1060_v25, 0.0  ;;  %v1189_v13 = vmax.f32 %v1061_v5, 0.0  ;;  %v1066_v50 = vadd.f32 %v2705_v51, %v932_v6  ;;  %v811_v5 = vld [vmem:[#allocation2 + $0x1e0] sm:$0xff]  ;;  %v812_v6 = vld [vmem:[#allocation2 + $0x1e8] sm:$0xff] }
 0x18b   : > { %v1190_v15 = vmax.f32 %v1062_v7, 0.0  ;;  %v1191_v16 = vmax.f32 %v1063_v8, 0.0  ;;  %v1192_v17 = vmax.f32 %v1064_v34, 0.0  ;;  %v1193_v20 = vmax.f32 %v1065_v9, 0.0  ;;  %v813_v7 = vld [vmem:[#allocation2 + $0x1f0] sm:$0xff] }
 0x18c   : > { %v2161_v23 = vpack.c.bf16 %v1187_v12, %v1187_v12  ;;  %v2162_v26 = vpack.c.bf16 %v1188_v11, %v1188_v11  ;;  %v2163_v57 = vpack.c.bf16 %v1189_v13, %v1189_v13  ;;  %v1194_v27 = vmax.f32 %v1066_v50, 0.0  ;;  %v814_v11 = vld [vmem:[#allocation2 + $0x1f8] sm:$0xff] }
 0x18d   : > { %v2164_v29 = vpack.c.bf16 %v1190_v15, %v1190_v15  ;;  %v2165_v33 = vpack.c.bf16 %v1191_v16, %v1191_v16  ;;  %v2166_v31 = vpack.c.bf16 %v1192_v17, %v1192_v17  ;;  %v2167_v36 = vpack.c.bf16 %v1193_v20, %v1193_v20 }
 0x18e   : > { %1828 = vst.msk [vmem:[%s3480_s3 + $0xa0] sm:$0xf] %vm1787_vm5, %v2161_v23  ;;  %1829 = vst.msk [vmem:[%s3480_s3 + $0xa4] sm:$0xf] %vm1787_vm5, %v2162_v26  ;;  %v2168_v18 = vpack.c.bf16 %v1194_v27, %v1194_v27  ;;  %v933_v39 = vmul.f32 %v2702_v45, %v799_v10  ;;  %v934_v42 = vmul.f32 %v2702_v45, %v800_v14 }
 0x18f   : > { %1830 = vst.msk [vmem:[%s3480_s3 + $0xa8] sm:$0xf] %vm1787_vm5, %v2163_v57  ;;  %v935_v41 = vmul.f32 %v2702_v45, %v801_v49  ;;  %1831 = vst.msk [vmem:[%s3480_s3 + $0xac] sm:$0xf] %vm1787_vm5, %v2164_v29  ;;  %v936_v44 = vmul.f32 %v2702_v45, %v802_v22  ;;  %v937_v35 = vmul.f32 %v2702_v45, %v803_v28 }
 0x190   : > { %1832 = vst.msk [vmem:[%s3480_s3 + $0xb0] sm:$0xf] %vm1787_vm5, %v2165_v33  ;;  %1833 = vst.msk [vmem:[%s3480_s3 + $0xb4] sm:$0xf] %vm1787_vm5, %v2166_v31  ;;  %v938_v46 = vmul.f32 %v2702_v45, %v804_v19  ;;  %v939_v47 = vmul.f32 %v2702_v45, %v805_v32  ;;  %v1067_v48 = vadd.f32 %v2705_v51, %v933_v39 }
 0x191   : > { %1834 = vst.msk [vmem:[%s3480_s3 + $0xb8] sm:$0xf] %vm1787_vm5, %v2167_v36  ;;  %1835 = vst.msk [vmem:[%s3480_s3 + $0xbc] sm:$0xf] %vm1787_vm5, %v2168_v18  ;;  %v1068_v2 = vadd.f32 %v2705_v51, %v934_v42  ;;  %v1069_v52 = vadd.f32 %v2705_v51, %v935_v41  ;;  %v940_v54 = vmul.f32 %v2702_v45, %v806_v38  ;;  %v815_v36 = vld [vmem:[#allocation2 + $0x200] sm:$0xff]  ;;  %v816_v38 = vld [vmem:[#allocation2 + $0x208] sm:$0xff] }
 0x192   : > { %v1070_v55 = vadd.f32 %v2705_v51, %v936_v44  ;;  %v1071_v24 = vadd.f32 %v2705_v51, %v937_v35  ;;  %v1072_v30 = vadd.f32 %v2705_v51, %v938_v46  ;;  %v1073_v56 = vadd.f32 %v2705_v51, %v939_v47  ;;  %v817_v44 = vld [vmem:[#allocation2 + $0x210] sm:$0xff]  ;;  %v818_v35 = vld [vmem:[#allocation2 + $0x218] sm:$0xff] }
 0x193   : > { %v1195_v58 = vmax.f32 %v1067_v48, 0.0  ;;  %v1196_v21 = vmax.f32 %v1068_v2, 0.0  ;;  %v1197_v43 = vmax.f32 %v1069_v52, 0.0  ;;  %v1074_v59 = vadd.f32 %v2705_v51, %v940_v54  ;;  %v819_v52 = vld [vmem:[#allocation2 + $0x220] sm:$0xff]  ;;  %v820_v54 = vld [vmem:[#allocation2 + $0x228] sm:$0xff] }
 0x194   : > { %v1198_v62 = vmax.f32 %v1070_v55, 0.0  ;;  %v1199_v40 = vmax.f32 %v1071_v24, 0.0  ;;  %v1200_v63 = vmax.f32 %v1072_v30, 0.0  ;;  %v1201_v0 = vmax.f32 %v1073_v56, 0.0  ;;  %v821_v55 = vld [vmem:[#allocation2 + $0x230] sm:$0xff] }
 0x195   : > { %v2169_v3 = vpack.c.bf16 %v1195_v58, %v1195_v58  ;;  %v2170_v4 = vpack.c.bf16 %v1196_v21, %v1196_v21  ;;  %v2171_v37 = vpack.c.bf16 %v1197_v43, %v1197_v43  ;;  %v1202_v25 = vmax.f32 %v1074_v59, 0.0  ;;  %v822_v21 = vld [vmem:[#allocation2 + $0x238] sm:$0xff] }
 0x196   : > { %v2172_v8 = vpack.c.bf16 %v1198_v62, %v1198_v62  ;;  %v2173_v34 = vpack.c.bf16 %v1199_v40, %v1199_v40  ;;  %v2174_v9 = vpack.c.bf16 %v1200_v63, %v1200_v63  ;;  %v2175_v12 = vpack.c.bf16 %v1201_v0, %v1201_v0 }
 0x197   : > { %1836 = vst.msk [vmem:[%s3480_s3 + $0xc0] sm:$0xf] %vm1787_vm5, %v2169_v3  ;;  %1837 = vst.msk [vmem:[%s3480_s3 + $0xc4] sm:$0xf] %vm1787_vm5, %v2170_v4  ;;  %v2176_v13 = vpack.c.bf16 %v1202_v25, %v1202_v25  ;;  %v941_v50 = vmul.f32 %v2702_v45, %v807_v60  ;;  %v942_v10 = vmul.f32 %v2702_v45, %v808_v61 }
 0x198   : > { %1838 = vst.msk [vmem:[%s3480_s3 + $0xc8] sm:$0xf] %vm1787_vm5, %v2171_v37  ;;  %v943_v14 = vmul.f32 %v2702_v45, %v809_v53  ;;  %1839 = vst.msk [vmem:[%s3480_s3 + $0xcc] sm:$0xf] %vm1787_vm5, %v2172_v8  ;;  %v944_v15 = vmul.f32 %v2702_v45, %v810_v1  ;;  %v945_v16 = vmul.f32 %v2702_v45, %v811_v5 }
 0x199   : > { %1840 = vst.msk [vmem:[%s3480_s3 + $0xd0] sm:$0xf] %vm1787_vm5, %v2173_v34  ;;  %1841 = vst.msk [vmem:[%s3480_s3 + $0xd4] sm:$0xf] %vm1787_vm5, %v2174_v9  ;;  %v946_v17 = vmul.f32 %v2702_v45, %v812_v6  ;;  %v947_v20 = vmul.f32 %v2702_v45, %v813_v7  ;;  %v1075_v49 = vadd.f32 %v2705_v51, %v941_v50 }
 0x19a   : > { %1842 = vst.msk [vmem:[%s3480_s3 + $0xd8] sm:$0xf] %vm1787_vm5, %v2175_v12  ;;  %1843 = vst.msk [vmem:[%s3480_s3 + $0xdc] sm:$0xf] %vm1787_vm5, %v2176_v13  ;;  %v1076_v22 = vadd.f32 %v2705_v51, %v942_v10  ;;  %v1077_v23 = vadd.f32 %v2705_v51, %v943_v14  ;;  %v948_v26 = vmul.f32 %v2702_v45, %v814_v11  ;;  %v823_v12 = vld [vmem:[#allocation2 + $0x240] sm:$0xff]  ;;  %v824_v11 = vld [vmem:[#allocation2 + $0x248] sm:$0xff] }
 0x19b   : > { %v1078_v57 = vadd.f32 %v2705_v51, %v944_v15  ;;  %v1079_v27 = vadd.f32 %v2705_v51, %v945_v16  ;;  %v1080_v28 = vadd.f32 %v2705_v51, %v946_v17  ;;  %v1081_v19 = vadd.f32 %v2705_v51, %v947_v20  ;;  %v825_v15 = vld [vmem:[#allocation2 + $0x250] sm:$0xff]  ;;  %v826_v16 = vld [vmem:[#allocation2 + $0x258] sm:$0xff] }
 0x19c   : > { %v1203_v32 = vmax.f32 %v1075_v49, 0.0  ;;  %v1204_v29 = vmax.f32 %v1076_v22, 0.0  ;;  %v1205_v33 = vmax.f32 %v1077_v23, 0.0  ;;  %v1082_v31 = vadd.f32 %v2705_v51, %v948_v26  ;;  %v827_v23 = vld [vmem:[#allocation2 + $0x260] sm:$0xff]  ;;  %v828_v26 = vld [vmem:[#allocation2 + $0x268] sm:$0xff] }
 0x19d   : > { %v1206_v18 = vmax.f32 %v1078_v57, 0.0  ;;  %v1207_v39 = vmax.f32 %v1079_v27, 0.0  ;;  %v1208_v42 = vmax.f32 %v1080_v28, 0.0  ;;  %v1209_v41 = vmax.f32 %v1081_v19, 0.0  ;;  %v829_v57 = vld [vmem:[#allocation2 + $0x270] sm:$0xff] }
 0x19e   : > { %v2177_v46 = vpack.c.bf16 %v1203_v32, %v1203_v32  ;;  %v2178_v47 = vpack.c.bf16 %v1204_v29, %v1204_v29  ;;  %v2179_v48 = vpack.c.bf16 %v1205_v33, %v1205_v33  ;;  %v1210_v2 = vmax.f32 %v1082_v31, 0.0  ;;  %v830_v29 = vld [vmem:[#allocation2 + $0x278] sm:$0xff] }
 0x19f   : > { %v2180_v24 = vpack.c.bf16 %v1206_v18, %v1206_v18  ;;  %v2181_v30 = vpack.c.bf16 %v1207_v39, %v1207_v39  ;;  %v2182_v56 = vpack.c.bf16 %v1208_v42, %v1208_v42  ;;  %v2183_v58 = vpack.c.bf16 %v1209_v41, %v1209_v41 }
 0x1a0   : > { %1844 = vst.msk [vmem:[%s3480_s3 + $0xe0] sm:$0xf] %vm1787_vm5, %v2177_v46  ;;  %1845 = vst.msk [vmem:[%s3480_s3 + $0xe4] sm:$0xf] %vm1787_vm5, %v2178_v47  ;;  %v2184_v43 = vpack.c.bf16 %v1210_v2, %v1210_v2  ;;  %v949_v59 = vmul.f32 %v2702_v45, %v815_v36  ;;  %v950_v60 = vmul.f32 %v2702_v45, %v816_v38 }
 0x1a1   : > { %1846 = vst.msk [vmem:[%s3480_s3 + $0xe8] sm:$0xf] %vm1787_vm5, %v2179_v48  ;;  %v951_v61 = vmul.f32 %v2702_v45, %v817_v44  ;;  %1847 = vst.msk [vmem:[%s3480_s3 + $0xec] sm:$0xf] %vm1787_vm5, %v2180_v24  ;;  %v952_v62 = vmul.f32 %v2702_v45, %v818_v35  ;;  %v953_v40 = vmul.f32 %v2702_v45, %v819_v52 }
 0x1a2   : > { %1848 = vst.msk [vmem:[%s3480_s3 + $0xf0] sm:$0xf] %vm1787_vm5, %v2181_v30  ;;  %1849 = vst.msk [vmem:[%s3480_s3 + $0xf4] sm:$0xf] %vm1787_vm5, %v2182_v56  ;;  %v954_v63 = vmul.f32 %v2702_v45, %v820_v54  ;;  %v955_v0 = vmul.f32 %v2702_v45, %v821_v55  ;;  %v1083_v53 = vadd.f32 %v2705_v51, %v949_v59 }
 0x1a3   : > { %1850 = vst.msk [vmem:[%s3480_s3 + $0xf8] sm:$0xf] %vm1787_vm5, %v2183_v58  ;;  %1851 = vst.msk [vmem:[%s3480_s3 + $0xfc] sm:$0xf] %vm1787_vm5, %v2184_v43  ;;  %v1084_v1 = vadd.f32 %v2705_v51, %v950_v60  ;;  %v1085_v3 = vadd.f32 %v2705_v51, %v951_v61  ;;  %v956_v4 = vmul.f32 %v2702_v45, %v822_v21  ;;  %v831_v58 = vld [vmem:[#allocation2 + $0x280] sm:$0xff]  ;;  %v832_v21 = vld [vmem:[#allocation2 + $0x288] sm:$0xff] }
 0x1a4   : > { %v1086_v37 = vadd.f32 %v2705_v51, %v952_v62  ;;  %v1087_v25 = vadd.f32 %v2705_v51, %v953_v40  ;;  %v1088_v5 = vadd.f32 %v2705_v51, %v954_v63  ;;  %v1089_v6 = vadd.f32 %v2705_v51, %v955_v0  ;;  %v833_v62 = vld [vmem:[#allocation2 + $0x290] sm:$0xff]  ;;  %v834_v40 = vld [vmem:[#allocation2 + $0x298] sm:$0xff] }
 0x1a5   : > { %v1211_v7 = vmax.f32 %v1083_v53, 0.0  ;;  %v1212_v8 = vmax.f32 %v1084_v1, 0.0  ;;  %v1213_v34 = vmax.f32 %v1085_v3, 0.0  ;;  %v1090_v9 = vadd.f32 %v2705_v51, %v956_v4  ;;  %v835_v3 = vld [vmem:[#allocation2 + $0x2a0] sm:$0xff]  ;;  %v836_v4 = vld [vmem:[#allocation2 + $0x2a8] sm:$0xff] }
 0x1a6   : > { %v1214_v13 = vmax.f32 %v1086_v37, 0.0  ;;  %v1215_v50 = vmax.f32 %v1087_v25, 0.0  ;;  %v1216_v10 = vmax.f32 %v1088_v5, 0.0  ;;  %v1217_v14 = vmax.f32 %v1089_v6, 0.0  ;;  %v837_v37 = vld [vmem:[#allocation2 + $0x2b0] sm:$0xff] }
 0x1a7   : > { %v2185_v17 = vpack.c.bf16 %v1211_v7, %v1211_v7  ;;  %v2186_v20 = vpack.c.bf16 %v1212_v8, %v1212_v8  ;;  %v2187_v49 = vpack.c.bf16 %v1213_v34, %v1213_v34  ;;  %v1218_v22 = vmax.f32 %v1090_v9, 0.0  ;;  %v838_v8 = vld [vmem:[#allocation2 + $0x2b8] sm:$0xff] }
 0x1a8   : > { %v2188_v27 = vpack.c.bf16 %v1214_v13, %v1214_v13  ;;  %v2189_v28 = vpack.c.bf16 %v1215_v50, %v1215_v50  ;;  %v2190_v19 = vpack.c.bf16 %v1216_v10, %v1216_v10  ;;  %v2191_v32 = vpack.c.bf16 %v1217_v14, %v1217_v14 }
 0x1a9   : > { %1852 = vst.msk [vmem:[%s3480_s3 + $0x100] sm:$0xf] %vm1787_vm5, %v2185_v17  ;;  %1853 = vst.msk [vmem:[%s3480_s3 + $0x104] sm:$0xf] %vm1787_vm5, %v2186_v20  ;;  %v2192_v33 = vpack.c.bf16 %v1218_v22, %v1218_v22  ;;  %v957_v31 = vmul.f32 %v2702_v45, %v823_v12  ;;  %v958_v36 = vmul.f32 %v2702_v45, %v824_v11 }
 0x1aa   : > { %1854 = vst.msk [vmem:[%s3480_s3 + $0x108] sm:$0xf] %vm1787_vm5, %v2187_v49  ;;  %v959_v38 = vmul.f32 %v2702_v45, %v825_v15  ;;  %1855 = vst.msk [vmem:[%s3480_s3 + $0x10c] sm:$0xf] %vm1787_vm5, %v2188_v27  ;;  %v960_v18 = vmul.f32 %v2702_v45, %v826_v16  ;;  %v961_v39 = vmul.f32 %v2702_v45, %v827_v23 }
 0x1ab   : > { %1856 = vst.msk [vmem:[%s3480_s3 + $0x110] sm:$0xf] %vm1787_vm5, %v2189_v28  ;;  %1857 = vst.msk [vmem:[%s3480_s3 + $0x114] sm:$0xf] %vm1787_vm5, %v2190_v19  ;;  %v962_v42 = vmul.f32 %v2702_v45, %v828_v26  ;;  %v963_v41 = vmul.f32 %v2702_v45, %v829_v57  ;;  %v1091_v44 = vadd.f32 %v2705_v51, %v957_v31 }
 0x1ac   : > { %1858 = vst.msk [vmem:[%s3480_s3 + $0x118] sm:$0xf] %vm1787_vm5, %v2191_v32  ;;  %1859 = vst.msk [vmem:[%s3480_s3 + $0x11c] sm:$0xf] %vm1787_vm5, %v2192_v33  ;;  %v1092_v35 = vadd.f32 %v2705_v51, %v958_v36  ;;  %v1093_v46 = vadd.f32 %v2705_v51, %v959_v38  ;;  %v964_v47 = vmul.f32 %v2702_v45, %v830_v29  ;;  %v839_v32 = vld [vmem:[#allocation2 + $0x2c0] sm:$0xff]  ;;  %v840_v29 = vld [vmem:[#allocation2 + $0x2c8] sm:$0xff] }
 0x1ad   : > { %v1094_v48 = vadd.f32 %v2705_v51, %v960_v18  ;;  %v1095_v2 = vadd.f32 %v2705_v51, %v961_v39  ;;  %v1096_v52 = vadd.f32 %v2705_v51, %v962_v42  ;;  %v1097_v54 = vadd.f32 %v2705_v51, %v963_v41  ;;  %v841_v18 = vld [vmem:[#allocation2 + $0x2d0] sm:$0xff]  ;;  %v842_v39 = vld [vmem:[#allocation2 + $0x2d8] sm:$0xff] }
 0x1ae   : > { %v1219_v55 = vmax.f32 %v1091_v44, 0.0  ;;  %v1220_v24 = vmax.f32 %v1092_v35, 0.0  ;;  %v1221_v30 = vmax.f32 %v1093_v46, 0.0  ;;  %v1098_v56 = vadd.f32 %v2705_v51, %v964_v47  ;;  %v843_v46 = vld [vmem:[#allocation2 + $0x2e0] sm:$0xff]  ;;  %v844_v47 = vld [vmem:[#allocation2 + $0x2e8] sm:$0xff] }
 0x1af   : > { %v1222_v43 = vmax.f32 %v1094_v48, 0.0  ;;  %v1223_v59 = vmax.f32 %v1095_v2, 0.0  ;;  %v1224_v60 = vmax.f32 %v1096_v52, 0.0  ;;  %v1225_v61 = vmax.f32 %v1097_v54, 0.0  ;;  %v845_v48 = vld [vmem:[#allocation2 + $0x2f0] sm:$0xff] }
 0x1b0   : > { %v2193_v63 = vpack.c.bf16 %v1219_v55, %v1219_v55  ;;  %v2194_v0 = vpack.c.bf16 %v1220_v24, %v1220_v24  ;;  %v2195_v53 = vpack.c.bf16 %v1221_v30, %v1221_v30  ;;  %v1226_v1 = vmax.f32 %v1098_v56, 0.0  ;;  %v846_v24 = vld [vmem:[#allocation2 + $0x2f8] sm:$0xff] }
 0x1b1   : > { %v2196_v25 = vpack.c.bf16 %v1222_v43, %v1222_v43  ;;  %v2197_v5 = vpack.c.bf16 %v1223_v59, %v1223_v59  ;;  %v2198_v6 = vpack.c.bf16 %v1224_v60, %v1224_v60  ;;  %v2199_v7 = vpack.c.bf16 %v1225_v61, %v1225_v61 }
 0x1b2   : > { %1860 = vst.msk [vmem:[%s3480_s3 + $0x120] sm:$0xf] %vm1787_vm5, %v2193_v63  ;;  %1861 = vst.msk [vmem:[%s3480_s3 + $0x124] sm:$0xf] %vm1787_vm5, %v2194_v0  ;;  %v2200_v34 = vpack.c.bf16 %v1226_v1, %v1226_v1  ;;  %v965_v9 = vmul.f32 %v2702_v45, %v831_v58  ;;  %v966_v12 = vmul.f32 %v2702_v45, %v832_v21 }
 0x1b3   : > { %1862 = vst.msk [vmem:[%s3480_s3 + $0x128] sm:$0xf] %vm1787_vm5, %v2195_v53  ;;  %v967_v11 = vmul.f32 %v2702_v45, %v833_v62  ;;  %1863 = vst.msk [vmem:[%s3480_s3 + $0x12c] sm:$0xf] %vm1787_vm5, %v2196_v25  ;;  %v968_v13 = vmul.f32 %v2702_v45, %v834_v40  ;;  %v969_v50 = vmul.f32 %v2702_v45, %v835_v3 }
 0x1b4   : > { %1864 = vst.msk [vmem:[%s3480_s3 + $0x130] sm:$0xf] %vm1787_vm5, %v2197_v5  ;;  %1865 = vst.msk [vmem:[%s3480_s3 + $0x134] sm:$0xf] %vm1787_vm5, %v2198_v6  ;;  %v970_v10 = vmul.f32 %v2702_v45, %v836_v4  ;;  %v971_v14 = vmul.f32 %v2702_v45, %v837_v37  ;;  %v1099_v15 = vadd.f32 %v2705_v51, %v965_v9 }
 0x1b5   : > { %1866 = vst.msk [vmem:[%s3480_s3 + $0x138] sm:$0xf] %vm1787_vm5, %v2199_v7  ;;  %1867 = vst.msk [vmem:[%s3480_s3 + $0x13c] sm:$0xf] %vm1787_vm5, %v2200_v34  ;;  %v1100_v16 = vadd.f32 %v2705_v51, %v966_v12  ;;  %v1101_v17 = vadd.f32 %v2705_v51, %v967_v11  ;;  %v972_v20 = vmul.f32 %v2702_v45, %v838_v8  ;;  %v847_v7 = vld [vmem:[#allocation2 + $0x300] sm:$0xff]  ;;  %v848_v8 = vld [vmem:[#allocation2 + $0x308] sm:$0xff] }
 0x1b6   : > { %v1102_v49 = vadd.f32 %v2705_v51, %v968_v13  ;;  %v1103_v22 = vadd.f32 %v2705_v51, %v969_v50  ;;  %v1104_v23 = vadd.f32 %v2705_v51, %v970_v10  ;;  %v1105_v26 = vadd.f32 %v2705_v51, %v971_v14  ;;  %v849_v13 = vld [vmem:[#allocation2 + $0x310] sm:$0xff]  ;;  %v850_v50 = vld [vmem:[#allocation2 + $0x318] sm:$0xff] }
 0x1b7   : > { %v1227_v57 = vmax.f32 %v1099_v15, 0.0  ;;  %v1228_v27 = vmax.f32 %v1100_v16, 0.0  ;;  %v1229_v28 = vmax.f32 %v1101_v17, 0.0  ;;  %v1106_v19 = vadd.f32 %v2705_v51, %v972_v20  ;;  %v851_v17 = vld [vmem:[#allocation2 + $0x320] sm:$0xff]  ;;  %v852_v20 = vld [vmem:[#allocation2 + $0x328] sm:$0xff] }
 0x1b8   : > { %v1230_v33 = vmax.f32 %v1102_v49, 0.0  ;;  %v1231_v31 = vmax.f32 %v1103_v22, 0.0  ;;  %v1232_v36 = vmax.f32 %v1104_v23, 0.0  ;;  %v1233_v38 = vmax.f32 %v1105_v26, 0.0  ;;  %v853_v49 = vld [vmem:[#allocation2 + $0x330] sm:$0xff] }
 0x1b9   : > { %v2201_v42 = vpack.c.bf16 %v1227_v57, %v1227_v57  ;;  %v2202_v41 = vpack.c.bf16 %v1228_v27, %v1228_v27  ;;  %v2203_v44 = vpack.c.bf16 %v1229_v28, %v1229_v28  ;;  %v1234_v35 = vmax.f32 %v1106_v19, 0.0  ;;  %v854_v27 = vld [vmem:[#allocation2 + $0x338] sm:$0xff] }
 0x1ba   : > { %v2204_v2 = vpack.c.bf16 %v1230_v33, %v1230_v33  ;;  %v2205_v52 = vpack.c.bf16 %v1231_v31, %v1231_v31  ;;  %v2206_v54 = vpack.c.bf16 %v1232_v36, %v1232_v36  ;;  %v2207_v55 = vpack.c.bf16 %v1233_v38, %v1233_v38 }
 0x1bb   : > { %1868 = vst.msk [vmem:[%s3480_s3 + $0x140] sm:$0xf] %vm1787_vm5, %v2201_v42  ;;  %1869 = vst.msk [vmem:[%s3480_s3 + $0x144] sm:$0xf] %vm1787_vm5, %v2202_v41  ;;  %v2208_v30 = vpack.c.bf16 %v1234_v35, %v1234_v35  ;;  %v973_v56 = vmul.f32 %v2702_v45, %v839_v32  ;;  %v974_v58 = vmul.f32 %v2702_v45, %v840_v29 }
 0x1bc   : > { %1870 = vst.msk [vmem:[%s3480_s3 + $0x148] sm:$0xf] %vm1787_vm5, %v2203_v44  ;;  %v975_v21 = vmul.f32 %v2702_v45, %v841_v18  ;;  %1871 = vst.msk [vmem:[%s3480_s3 + $0x14c] sm:$0xf] %vm1787_vm5, %v2204_v2  ;;  %v976_v43 = vmul.f32 %v2702_v45, %v842_v39  ;;  %v977_v59 = vmul.f32 %v2702_v45, %v843_v46 }
 0x1bd   : > { %1872 = vst.msk [vmem:[%s3480_s3 + $0x150] sm:$0xf] %vm1787_vm5, %v2205_v52  ;;  %1873 = vst.msk [vmem:[%s3480_s3 + $0x154] sm:$0xf] %vm1787_vm5, %v2206_v54  ;;  %v978_v60 = vmul.f32 %v2702_v45, %v844_v47  ;;  %v979_v61 = vmul.f32 %v2702_v45, %v845_v48  ;;  %v1107_v62 = vadd.f32 %v2705_v51, %v973_v56 }
 0x1be   : > { %1874 = vst.msk [vmem:[%s3480_s3 + $0x158] sm:$0xf] %vm1787_vm5, %v2207_v55  ;;  %1875 = vst.msk [vmem:[%s3480_s3 + $0x15c] sm:$0xf] %vm1787_vm5, %v2208_v30  ;;  %v1108_v40 = vadd.f32 %v2705_v51, %v974_v58  ;;  %v1109_v63 = vadd.f32 %v2705_v51, %v975_v21  ;;  %v980_v0 = vmul.f32 %v2702_v45, %v846_v24  ;;  %v855_v55 = vld [vmem:[#allocation2 + $0x340] sm:$0xff]  ;;  %v856_v24 = vld [vmem:[#allocation2 + $0x348] sm:$0xff] }
 0x1bf   : > { %v1110_v53 = vadd.f32 %v2705_v51, %v976_v43  ;;  %v1111_v1 = vadd.f32 %v2705_v51, %v977_v59  ;;  %v1112_v3 = vadd.f32 %v2705_v51, %v978_v60  ;;  %v1113_v4 = vadd.f32 %v2705_v51, %v979_v61  ;;  %v857_v43 = vld [vmem:[#allocation2 + $0x350] sm:$0xff]  ;;  %v858_v59 = vld [vmem:[#allocation2 + $0x358] sm:$0xff] }
 0x1c0   : > { %v1235_v37 = vmax.f32 %v1107_v62, 0.0  ;;  %v1236_v25 = vmax.f32 %v1108_v40, 0.0  ;;  %v1237_v5 = vmax.f32 %v1109_v63, 0.0  ;;  %v1114_v6 = vadd.f32 %v2705_v51, %v980_v0  ;;  %v859_v63 = vld [vmem:[#allocation2 + $0x360] sm:$0xff]  ;;  %v860_v0 = vld [vmem:[#allocation2 + $0x368] sm:$0xff] }
 0x1c1   : > { %v1238_v34 = vmax.f32 %v1110_v53, 0.0  ;;  %v1239_v9 = vmax.f32 %v1111_v1, 0.0  ;;  %v1240_v12 = vmax.f32 %v1112_v3, 0.0  ;;  %v1241_v11 = vmax.f32 %v1113_v4, 0.0  ;;  %v861_v53 = vld [vmem:[#allocation2 + $0x370] sm:$0xff] }
 0x1c2   : > { %v2209_v10 = vpack.c.bf16 %v1235_v37, %v1235_v37  ;;  %v2210_v14 = vpack.c.bf16 %v1236_v25, %v1236_v25  ;;  %v2211_v15 = vpack.c.bf16 %v1237_v5, %v1237_v5  ;;  %v1242_v16 = vmax.f32 %v1114_v6, 0.0  ;;  %v862_v25 = vld [vmem:[#allocation2 + $0x378] sm:$0xff] }
 0x1c3   : > { %v2212_v22 = vpack.c.bf16 %v1238_v34, %v1238_v34  ;;  %v2213_v23 = vpack.c.bf16 %v1239_v9, %v1239_v9  ;;  %v2214_v26 = vpack.c.bf16 %v1240_v12, %v1240_v12  ;;  %v2215_v57 = vpack.c.bf16 %v1241_v11, %v1241_v11 }
 0x1c4   : > { %1876 = vst.msk [vmem:[%s3480_s3 + $0x160] sm:$0xf] %vm1787_vm5, %v2209_v10  ;;  %1877 = vst.msk [vmem:[%s3480_s3 + $0x164] sm:$0xf] %vm1787_vm5, %v2210_v14  ;;  %v2216_v28 = vpack.c.bf16 %v1242_v16, %v1242_v16  ;;  %v981_v19 = vmul.f32 %v2702_v45, %v847_v7  ;;  %v982_v32 = vmul.f32 %v2702_v45, %v848_v8 }
 0x1c5   : > { %1878 = vst.msk [vmem:[%s3480_s3 + $0x168] sm:$0xf] %vm1787_vm5, %v2211_v15  ;;  %v983_v29 = vmul.f32 %v2702_v45, %v849_v13  ;;  %1879 = vst.msk [vmem:[%s3480_s3 + $0x16c] sm:$0xf] %vm1787_vm5, %v2212_v22  ;;  %v984_v33 = vmul.f32 %v2702_v45, %v850_v50  ;;  %v985_v31 = vmul.f32 %v2702_v45, %v851_v17 }
 0x1c6   : > { %1880 = vst.msk [vmem:[%s3480_s3 + $0x170] sm:$0xf] %vm1787_vm5, %v2213_v23  ;;  %1881 = vst.msk [vmem:[%s3480_s3 + $0x174] sm:$0xf] %vm1787_vm5, %v2214_v26  ;;  %v986_v36 = vmul.f32 %v2702_v45, %v852_v20  ;;  %v987_v38 = vmul.f32 %v2702_v45, %v853_v49  ;;  %v1115_v18 = vadd.f32 %v2705_v51, %v981_v19 }
 0x1c7   : > { %1882 = vst.msk [vmem:[%s3480_s3 + $0x178] sm:$0xf] %vm1787_vm5, %v2215_v57  ;;  %1883 = vst.msk [vmem:[%s3480_s3 + $0x17c] sm:$0xf] %vm1787_vm5, %v2216_v28  ;;  %v1116_v39 = vadd.f32 %v2705_v51, %v982_v32  ;;  %v1117_v42 = vadd.f32 %v2705_v51, %v983_v29  ;;  %v988_v41 = vmul.f32 %v2702_v45, %v854_v27  ;;  %v863_v57 = vld [vmem:[#allocation2 + $0x380] sm:$0xff]  ;;  %v864_v27 = vld [vmem:[#allocation2 + $0x388] sm:$0xff] }
 0x1c8   : > { %v1118_v44 = vadd.f32 %v2705_v51, %v984_v33  ;;  %v1119_v35 = vadd.f32 %v2705_v51, %v985_v31  ;;  %v1120_v46 = vadd.f32 %v2705_v51, %v986_v36  ;;  %v1121_v47 = vadd.f32 %v2705_v51, %v987_v38  ;;  %v865_v33 = vld [vmem:[#allocation2 + $0x390] sm:$0xff]  ;;  %v866_v31 = vld [vmem:[#allocation2 + $0x398] sm:$0xff] }
 0x1c9   : > { %v1243_v48 = vmax.f32 %v1115_v18, 0.0  ;;  %v1244_v2 = vmax.f32 %v1116_v39, 0.0  ;;  %v1245_v52 = vmax.f32 %v1117_v42, 0.0  ;;  %v1122_v54 = vadd.f32 %v2705_v51, %v988_v41  ;;  %v867_v42 = vld [vmem:[#allocation2 + $0x3a0] sm:$0xff]  ;;  %v868_v41 = vld [vmem:[#allocation2 + $0x3a8] sm:$0xff] }
 0x1ca   : > { %v1246_v30 = vmax.f32 %v1118_v44, 0.0  ;;  %v1247_v56 = vmax.f32 %v1119_v35, 0.0  ;;  %v1248_v58 = vmax.f32 %v1120_v46, 0.0  ;;  %v1249_v21 = vmax.f32 %v1121_v47, 0.0  ;;  %v869_v44 = vld [vmem:[#allocation2 + $0x3b0] sm:$0xff] }
 0x1cb   : > { %v2217_v60 = vpack.c.bf16 %v1243_v48, %v1243_v48  ;;  %v2218_v61 = vpack.c.bf16 %v1244_v2, %v1244_v2  ;;  %v2219_v62 = vpack.c.bf16 %v1245_v52, %v1245_v52  ;;  %v1250_v40 = vmax.f32 %v1122_v54, 0.0  ;;  %v870_v2 = vld [vmem:[#allocation2 + $0x3b8] sm:$0xff] }
 0x1cc   : > { %v2220_v1 = vpack.c.bf16 %v1246_v30, %v1246_v30  ;;  %v2221_v3 = vpack.c.bf16 %v1247_v56, %v1247_v56  ;;  %v2222_v4 = vpack.c.bf16 %v1248_v58, %v1248_v58  ;;  %v2223_v37 = vpack.c.bf16 %v1249_v21, %v1249_v21 }
 0x1cd   : > { %1884 = vst.msk [vmem:[%s3480_s3 + $0x180] sm:$0xf] %vm1787_vm5, %v2217_v60  ;;  %1885 = vst.msk [vmem:[%s3480_s3 + $0x184] sm:$0xf] %vm1787_vm5, %v2218_v61  ;;  %v2224_v5 = vpack.c.bf16 %v1250_v40, %v1250_v40  ;;  %v989_v6 = vmul.f32 %v2702_v45, %v855_v55  ;;  %v990_v7 = vmul.f32 %v2702_v45, %v856_v24 }
 0x1ce   : > { %1886 = vst.msk [vmem:[%s3480_s3 + $0x188] sm:$0xf] %vm1787_vm5, %v2219_v62  ;;  %v991_v8 = vmul.f32 %v2702_v45, %v857_v43  ;;  %1887 = vst.msk [vmem:[%s3480_s3 + $0x18c] sm:$0xf] %vm1787_vm5, %v2220_v1  ;;  %v992_v34 = vmul.f32 %v2702_v45, %v858_v59  ;;  %v993_v9 = vmul.f32 %v2702_v45, %v859_v63 }
 0x1cf   : > { %1888 = vst.msk [vmem:[%s3480_s3 + $0x190] sm:$0xf] %vm1787_vm5, %v2221_v3  ;;  %1889 = vst.msk [vmem:[%s3480_s3 + $0x194] sm:$0xf] %vm1787_vm5, %v2222_v4  ;;  %v994_v12 = vmul.f32 %v2702_v45, %v860_v0  ;;  %v995_v11 = vmul.f32 %v2702_v45, %v861_v53  ;;  %v1123_v13 = vadd.f32 %v2705_v51, %v989_v6 }
 0x1d0   : > { %1890 = vst.msk [vmem:[%s3480_s3 + $0x198] sm:$0xf] %vm1787_vm5, %v2223_v37  ;;  %1891 = vst.msk [vmem:[%s3480_s3 + $0x19c] sm:$0xf] %vm1787_vm5, %v2224_v5  ;;  %v1124_v50 = vadd.f32 %v2705_v51, %v990_v7  ;;  %v1125_v10 = vadd.f32 %v2705_v51, %v991_v8  ;;  %v996_v14 = vmul.f32 %v2702_v45, %v862_v25  ;;  %v871_v37 = vld [vmem:[#allocation2 + $0x3c0] sm:$0xff]  ;;  %v872_v25 = vld [vmem:[#allocation2 + $0x3c8] sm:$0xff] }
 0x1d1   : > { %v1126_v15 = vadd.f32 %v2705_v51, %v992_v34  ;;  %v1127_v16 = vadd.f32 %v2705_v51, %v993_v9  ;;  %v1128_v17 = vadd.f32 %v2705_v51, %v994_v12  ;;  %v1129_v20 = vadd.f32 %v2705_v51, %v995_v11  ;;  %v873_v34 = vld [vmem:[#allocation2 + $0x3d0] sm:$0xff]  ;;  %v874_v9 = vld [vmem:[#allocation2 + $0x3d8] sm:$0xff] }
 0x1d2   : > { %v1251_v49 = vmax.f32 %v1123_v13, 0.0  ;;  %v1252_v22 = vmax.f32 %v1124_v50, 0.0  ;;  %v1253_v23 = vmax.f32 %v1125_v10, 0.0  ;;  %v1130_v26 = vadd.f32 %v2705_v51, %v996_v14  ;;  %v875_v10 = vld [vmem:[#allocation2 + $0x3e0] sm:$0xff]  ;;  %v876_v14 = vld [vmem:[#allocation2 + $0x3e8] sm:$0xff] }
 0x1d3   : > { %v1254_v28 = vmax.f32 %v1126_v15, 0.0  ;;  %v1255_v19 = vmax.f32 %v1127_v16, 0.0  ;;  %v1256_v32 = vmax.f32 %v1128_v17, 0.0  ;;  %v1257_v29 = vmax.f32 %v1129_v20, 0.0  ;;  %v877_v15 = vld [vmem:[#allocation2 + $0x3f0] sm:$0xff] }
 0x1d4   : > { %v2225_v36 = vpack.c.bf16 %v1251_v49, %v1251_v49  ;;  %v2226_v38 = vpack.c.bf16 %v1252_v22, %v1252_v22  ;;  %v2227_v18 = vpack.c.bf16 %v1253_v23, %v1253_v23  ;;  %v1258_v39 = vmax.f32 %v1130_v26, 0.0  ;;  %v878_v22 = vld [vmem:[#allocation2 + $0x3f8] sm:$0xff] }
 0x1d5   : > { %v2228_v35 = vpack.c.bf16 %v1254_v28, %v1254_v28  ;;  %v2229_v46 = vpack.c.bf16 %v1255_v19, %v1255_v19  ;;  %v2230_v47 = vpack.c.bf16 %v1256_v32, %v1256_v32  ;;  %v2231_v48 = vpack.c.bf16 %v1257_v29, %v1257_v29 }
 0x1d6   : > { %1892 = vst.msk [vmem:[%s3480_s3 + $0x1a0] sm:$0xf] %vm1787_vm5, %v2225_v36  ;;  %1893 = vst.msk [vmem:[%s3480_s3 + $0x1a4] sm:$0xf] %vm1787_vm5, %v2226_v38  ;;  %v2232_v52 = vpack.c.bf16 %v1258_v39, %v1258_v39  ;;  %v997_v54 = vmul.f32 %v2702_v45, %v863_v57  ;;  %v998_v55 = vmul.f32 %v2702_v45, %v864_v27 }
 0x1d7   : > { %1894 = vst.msk [vmem:[%s3480_s3 + $0x1a8] sm:$0xf] %vm1787_vm5, %v2227_v18  ;;  %v999_v24 = vmul.f32 %v2702_v45, %v865_v33  ;;  %1895 = vst.msk [vmem:[%s3480_s3 + $0x1ac] sm:$0xf] %vm1787_vm5, %v2228_v35  ;;  %v1000_v30 = vmul.f32 %v2702_v45, %v866_v31  ;;  %v1001_v56 = vmul.f32 %v2702_v45, %v867_v42 }
 0x1d8   : > { %1896 = vst.msk [vmem:[%s3480_s3 + $0x1b0] sm:$0xf] %vm1787_vm5, %v2229_v46  ;;  %1897 = vst.msk [vmem:[%s3480_s3 + $0x1b4] sm:$0xf] %vm1787_vm5, %v2230_v47  ;;  %v1002_v58 = vmul.f32 %v2702_v45, %v868_v41  ;;  %v1003_v21 = vmul.f32 %v2702_v45, %v869_v44  ;;  %v1131_v43 = vadd.f32 %v2705_v51, %v997_v54 }
 0x1d9   : > { %1898 = vst.msk [vmem:[%s3480_s3 + $0x1b8] sm:$0xf] %vm1787_vm5, %v2231_v48  ;;  %1899 = vst.msk [vmem:[%s3480_s3 + $0x1bc] sm:$0xf] %vm1787_vm5, %v2232_v52  ;;  %v1132_v59 = vadd.f32 %v2705_v51, %v998_v55  ;;  %v1133_v60 = vadd.f32 %v2705_v51, %v999_v24  ;;  %v1004_v61 = vmul.f32 %v2702_v45, %v870_v2 }
 0x1da   : > { %v1134_v62 = vadd.f32 %v2705_v51, %v1000_v30  ;;  %v1135_v40 = vadd.f32 %v2705_v51, %v1001_v56  ;;  %v1136_v63 = vadd.f32 %v2705_v51, %v1002_v58  ;;  %v1137_v0 = vadd.f32 %v2705_v51, %v1003_v21 }
 0x1db   : > { %v1259_v53 = vmax.f32 %v1131_v43, 0.0  ;;  %v1260_v1 = vmax.f32 %v1132_v59, 0.0  ;;  %v1261_v3 = vmax.f32 %v1133_v60, 0.0  ;;  %v1138_v4 = vadd.f32 %v2705_v51, %v1004_v61 }
 0x1dc   : > { %v1262_v5 = vmax.f32 %v1134_v62, 0.0  ;;  %v1263_v6 = vmax.f32 %v1135_v40, 0.0  ;;  %v1264_v7 = vmax.f32 %v1136_v63, 0.0  ;;  %v1265_v8 = vmax.f32 %v1137_v0, 0.0 }
 0x1dd   : > { %v2233_v12 = vpack.c.bf16 %v1259_v53, %v1259_v53  ;;  %v2234_v11 = vpack.c.bf16 %v1260_v1, %v1260_v1  ;;  %v2235_v13 = vpack.c.bf16 %v1261_v3, %v1261_v3  ;;  %v1266_v50 = vmax.f32 %v1138_v4, 0.0 }
 0x1de   : > { %v2236_v16 = vpack.c.bf16 %v1262_v5, %v1262_v5  ;;  %v2237_v17 = vpack.c.bf16 %v1263_v6, %v1263_v6  ;;  %v2238_v20 = vpack.c.bf16 %v1264_v7, %v1264_v7  ;;  %v2239_v49 = vpack.c.bf16 %v1265_v8, %v1265_v8 }
 0x1df   : > { %1900 = vst.msk [vmem:[%s3480_s3 + $0x1c0] sm:$0xf] %vm1787_vm5, %v2233_v12  ;;  %1901 = vst.msk [vmem:[%s3480_s3 + $0x1c4] sm:$0xf] %vm1787_vm5, %v2234_v11  ;;  %v2240_v23 = vpack.c.bf16 %v1266_v50, %v1266_v50  ;;  %v1005_v26 = vmul.f32 %v2702_v45, %v871_v37  ;;  %v1006_v57 = vmul.f32 %v2702_v45, %v872_v25 }
 0x1e0   : > { %1902 = vst.msk [vmem:[%s3480_s3 + $0x1c8] sm:$0xf] %vm1787_vm5, %v2235_v13  ;;  %v1007_v27 = vmul.f32 %v2702_v45, %v873_v34  ;;  %1903 = vst.msk [vmem:[%s3480_s3 + $0x1cc] sm:$0xf] %vm1787_vm5, %v2236_v16  ;;  %v1008_v28 = vmul.f32 %v2702_v45, %v874_v9  ;;  %v1009_v19 = vmul.f32 %v2702_v45, %v875_v10 }
 0x1e1   : > { %1904 = vst.msk [vmem:[%s3480_s3 + $0x1d0] sm:$0xf] %vm1787_vm5, %v2237_v17  ;;  %1905 = vst.msk [vmem:[%s3480_s3 + $0x1d4] sm:$0xf] %vm1787_vm5, %v2238_v20  ;;  %v1010_v32 = vmul.f32 %v2702_v45, %v876_v14  ;;  %v1011_v29 = vmul.f32 %v2702_v45, %v877_v15  ;;  %v1139_v33 = vadd.f32 %v2705_v51, %v1005_v26 }
 0x1e2   : > { %1906 = vst.msk [vmem:[%s3480_s3 + $0x1d8] sm:$0xf] %vm1787_vm5, %v2239_v49  ;;  %1907 = vst.msk [vmem:[%s3480_s3 + $0x1dc] sm:$0xf] %vm1787_vm5, %v2240_v23  ;;  %v1140_v31 = vadd.f32 %v2705_v51, %v1006_v57  ;;  %v1141_v36 = vadd.f32 %v2705_v51, %v1007_v27  ;;  %v1012_v38 = vmul.f32 %v2702_v45, %v878_v22 }
 0x1e3   : > { %v1142_v18 = vadd.f32 %v2705_v51, %v1008_v28  ;;  %v1143_v39 = vadd.f32 %v2705_v51, %v1009_v19  ;;  %v1144_v42 = vadd.f32 %v2705_v51, %v1010_v32  ;;  %v1145_v41 = vadd.f32 %v2705_v51, %v1011_v29 }
 0x1e4   : > { %v1267_v44 = vmax.f32 %v1139_v33, 0.0  ;;  %v1268_v35 = vmax.f32 %v1140_v31, 0.0  ;;  %v1269_v46 = vmax.f32 %v1141_v36, 0.0  ;;  %v1146_v47 = vadd.f32 %v2705_v51, %v1012_v38 }
 0x1e5   : > { %v1270_v48 = vmax.f32 %v1142_v18, 0.0  ;;  %v1271_v2 = vmax.f32 %v1143_v39, 0.0  ;;  %v1272_v52 = vmax.f32 %v1144_v42, 0.0  ;;  %v1273_v54 = vmax.f32 %v1145_v41, 0.0 }
 0x1e6   : > { %v2241_v55 = vpack.c.bf16 %v1267_v44, %v1267_v44  ;;  %v2242_v24 = vpack.c.bf16 %v1268_v35, %v1268_v35  ;;  %v2243_v45 = vpack.c.bf16 %v1269_v46, %v1269_v46  ;;  %v1274_v30 = vmax.f32 %v1146_v47, 0.0 }
 0x1e7   : > { %v2244_v56 = vpack.c.bf16 %v1270_v48, %v1270_v48  ;;  %v2245_v58 = vpack.c.bf16 %v1271_v2, %v1271_v2  ;;  %v2246_v21 = vpack.c.bf16 %v1272_v52, %v1272_v52  ;;  %v2247_v43 = vpack.c.bf16 %v1273_v54, %v1273_v54 }
 0x1e8   : > { %1908 = vst.msk [vmem:[%s3480_s3 + $0x1e0] sm:$0xf] %vm1787_vm5, %v2241_v55  ;;  %1909 = vst.msk [vmem:[%s3480_s3 + $0x1e4] sm:$0xf] %vm1787_vm5, %v2242_v24  ;;  %v2248_v51 = vpack.c.bf16 %v1274_v30, %v1274_v30 }
 0x1e9   : > { %1910 = vst.msk [vmem:[%s3480_s3 + $0x1e8] sm:$0xf] %vm1787_vm5, %v2243_v45  ;;  %1911 = vst.msk [vmem:[%s3480_s3 + $0x1ec] sm:$0xf] %vm1787_vm5, %v2244_v56 }
 0x1ea   : > { %1912 = vst.msk [vmem:[%s3480_s3 + $0x1f0] sm:$0xf] %vm1787_vm5, %v2245_v58  ;;  %1913 = vst.msk [vmem:[%s3480_s3 + $0x1f4] sm:$0xf] %vm1787_vm5, %v2246_v21 }
 0x1eb   : > { %1914 = vst.msk [vmem:[%s3480_s3 + $0x1f8] sm:$0xf] %vm1787_vm5, %v2247_v43  ;;  %1915 = vst.msk [vmem:[%s3480_s3 + $0x1fc] sm:$0xf] %vm1787_vm5, %v2248_v51 }
 0x1ec PF: > { %s13_s12 = sadd.s32 1, %s2350_s12  }
 0x1ed   : > { %p10_p6 = scmp.ge.s32.totalorder %s13_s12, 6  }
 0x1ef   :  { %12 = sbr.rel (!%p10_p6) target bundleno = 1 (0x1), region = 67 }

</bundles_post_ra>
